<compile_context>
chip_gen: v5e
topology: v5e:2x2
jax: 0.10.0
libtpu: 0.0.40
codegen_flags: <defaults>
</compile_context>

<pallas_src>
import math
import functools

import jax
import jax.numpy as jnp
from jax import lax
from jax.experimental import pallas as pl
from jax.experimental.pallas import tpu as pltpu


# ----------------------------------------------------------------------------
# Helpers
# ----------------------------------------------------------------------------
def _torch_layernorm(x, w, b, eps):
    # torch.nn.LayerNorm: biased variance, eps inside the sqrt.
    mean = jnp.mean(x, axis=-1, keepdims=True)
    c = x - mean
    var = jnp.mean(c * c, axis=-1, keepdims=True)
    return c * lax.rsqrt(var + eps) * w + b


def _vmem_limit_bytes(S, H, FF):
    # Rough explicit budget: double-buffered bf16 weight blocks + activations +
    # intermediates, with 3x headroom, capped safely below v7x's 64 MiB VMEM.
    bf, f4 = 2, 4
    wts = (H * 3 * H * bf + 3 * H * f4 + H * H * bf + H * f4 + 2 * H * f4
           + H * FF * bf + FF * f4 + FF * H * bf + H * f4 + 2 * H * f4)
    act = S * H * f4
    interm = 2 * S * FF * f4 + 2 * S * 3 * H * f4 + 8 * S * H * f4
    need = 2 * wts + 4 * act + interm + 4 * H * f4
    return int(min(max(3 * need, 16 << 20), 48 << 20))


# ----------------------------------------------------------------------------
# Fused kernel: grid = (batch [parallel], layer [arbitrary/sequential])
# ----------------------------------------------------------------------------
def _fused_layer_kernel(
        # layer-invariant inputs
        x_ref, pe_ref, emb_ref, alpha_ref, beta_ref,
        # per-layer (L-stacked) inputs
        wqkv_ref, bqkv_ref, wo_ref, bo_ref, n1w_ref, n1b_ref,
        w1_ref, b1_ref, w2_ref, b2_ref, n2w_ref, n2b_ref,
        # output (resident accumulator across the layer axis) + scratch
        o_ref, yt_ref,
        *, nhead, scale):
    f32 = jnp.float32
    bf16 = jnp.bfloat16
    l = pl.program_id(1)
    _, S, H = o_ref.shape
    hd = H // nhead

    # --- first layer step: activation := x + PE; also compute the layer-
    #     invariant time-embedding custom LayerNorm term once per batch block.
    @pl.when(l == 0)
    def _():
        o_ref[0] = x_ref[0] + pe_ref[...]
        e = emb_ref[0]                                          # [1, H]
        mu = jnp.mean(e, axis=-1, keepdims=True)
        off = e - mu
        var_u = jnp.sum(off * off, axis=-1, keepdims=True) * (1.0 / (H - 1))
        sigma = jnp.sqrt(var_u) + 1e-6                          # torch.std (unbiased) + eps
        # module LayerNorm: alpha * ((x - mean)/sigma + beta)
        yt_ref[...] = alpha_ref[...] * (off * pl.reciprocal(sigma) + beta_ref[...])

    x = o_ref[0]                                                # [S, H] resident activation
    yt = yt_ref[...]                                            # [1, H]

    # --- multi-head self-attention: fused lane-dense QKV projection ----------
    xb = x.astype(bf16)
    qkv = jnp.dot(xb, wqkv_ref[0], preferred_element_type=f32) + bqkv_ref[0]   # [S, 3H]

    # head split: cheap static lane slices stacked head-major (no transposes).
    q = jnp.stack([qkv[:, h * hd:(h + 1) * hd] for h in range(nhead)], axis=0)          # [h,S,hd]
    k = jnp.stack([qkv[:, H + h * hd:H + (h + 1) * hd] for h in range(nhead)], axis=0)
    v = jnp.stack([qkv[:, 2 * H + h * hd:2 * H + (h + 1) * hd] for h in range(nhead)], axis=0)

    s = jnp.einsum('hqd,hkd->hqk', q, k, preferred_element_type=f32) * scale             # [h,S,S]
    s = s - jnp.max(s, axis=-1, keepdims=True)
    p = jnp.exp(s)
    p = p * pl.reciprocal(jnp.sum(p, axis=-1, keepdims=True), approx=True)
    ctx = jnp.einsum('hqk,hkd->hqd', p, v, preferred_element_type=f32)                   # [h,S,hd]

    # single-contraction out-projection: concat heads back to [S, H], one matmul.
    ctx2 = jnp.concatenate([ctx[h] for h in range(nhead)], axis=-1)                      # [S, H]
    sa = jnp.dot(ctx2.astype(bf16), wo_ref[0], preferred_element_type=f32) + bo_ref[0]

    # --- residual + norm1 (torch.nn.LayerNorm, eps=1e-5, post-norm) ----------
    x1 = _torch_layernorm(x + sa, n1w_ref[0], n1b_ref[0], 1e-5)

    # --- feed forward (bf16 weights, f32 accumulate, ReLU) --------------------
    h1 = jnp.dot(x1.astype(bf16), w1_ref[0], preferred_element_type=f32) + b1_ref[0]
    h1 = jnp.maximum(h1, 0.0)
    ff = jnp.dot(h1.astype(bf16), w2_ref[0], preferred_element_type=f32) + b2_ref[0]

    # --- residual + norm2 + time-embedding term -------------------------------
    o_ref[0] = _torch_layernorm(x1 + ff, n2w_ref[0], n2b_ref[0], 1e-5) + yt


# ----------------------------------------------------------------------------
# Wrapper
# ----------------------------------------------------------------------------
def transformer_forward(x, t, attention_mask, params, *, nhead=8):
    # attention_mask accepted for API parity; the PyTorch module never forwards
    # it to the encoder layers.
    del attention_mask
    B, S, H = x.shape
    hd = H // nhead
    L, _, FF = params["w1"].shape

    pe = params["pos_enc"][:S]                      # [S, H]
    emb = params["time_emb"][t][:, None, :]         # [B, 1, H]  (embedding gather = glue)

    kernel = functools.partial(_fused_layer_kernel,
                               nhead=nhead, scale=1.0 / math.sqrt(hd))

    lmap = lambda b, l: (l, 0, 0)                   # per-layer (L-stacked) blocks
    bmap = lambda b, l: (b, 0, 0)                   # per-batch blocks
    inv2 = lambda b, l: (0, 0)                      # layer/batch-invariant 2-D blocks

    y = pl.pallas_call(
        kernel,
        out_shape=jax.ShapeDtypeStruct((B, S, H), jnp.float32),
        grid=(B, L),
        in_specs=[
            pl.BlockSpec((1, S, H), bmap),          # x
            pl.BlockSpec((S, H), inv2),             # positional encoding
            pl.BlockSpec((1, 1, H), bmap),          # time embedding row (per batch)
            pl.BlockSpec((1, H), inv2),             # custom-LN alpha
            pl.BlockSpec((1, H), inv2),             # custom-LN beta
            pl.BlockSpec((1, H, 3 * H), lmap),      # fused Wqkv  (bf16, lane-dense)
            pl.BlockSpec((1, 1, 3 * H), lmap),      # fused bqkv  (lane-dense)
            pl.BlockSpec((1, H, H), lmap),          # Wo
            pl.BlockSpec((1, 1, H), lmap),          # bo
            pl.BlockSpec((1, 1, H), lmap),          # norm1 w
            pl.BlockSpec((1, 1, H), lmap),          # norm1 b
            pl.BlockSpec((1, H, FF), lmap),         # linear1 w
            pl.BlockSpec((1, 1, FF), lmap),         # linear1 b
            pl.BlockSpec((1, FF, H), lmap),         # linear2 w
            pl.BlockSpec((1, 1, H), lmap),          # linear2 b
            pl.BlockSpec((1, 1, H), lmap),          # norm2 w
            pl.BlockSpec((1, 1, H), lmap),          # norm2 b
        ],
        out_specs=pl.BlockSpec((1, S, H), bmap),    # constant over l => resident activation
        scratch_shapes=[pltpu.VMEM((1, H), jnp.float32)],   # yt (time-emb LN), per batch block
        compiler_params=pltpu.CompilerParams(
            dimension_semantics=("parallel", "arbitrary"),
            vmem_limit_bytes=_vmem_limit_bytes(S, H, FF)),
    )(x, pe, emb, params["ln_alpha"], params["ln_beta"],
      params["wqkv"], params["bqkv"], params["wo"], params["bo"],
      params["n1w"], params["n1b"], params["w1"], params["b1"],
      params["w2"], params["b2"], params["n2w"], params["n2b"])

    y_decoded = None                                # decoder=None in the module
    return y, y_decoded


# ----------------------------------------------------------------------------
# Deterministic parameter init (shapes follow the PyTorch module's __init__)
# ----------------------------------------------------------------------------
def init_params(key, *, hidden_dim, timesteps, max_seq_len, nlayers, ff_dim, nhead):
    del nhead  # attention weights are stored fused/lane-dense, not head-major
    H, FF, L = hidden_dim, ff_dim, nlayers

    # Positional-encoding table (same formula as PositionalEncoding.__init__).
    position = jnp.arange(max_seq_len, dtype=jnp.float32)[:, None]
    div_term = jnp.exp(jnp.arange(0, H, 2, dtype=jnp.float32) * (-math.log(10000.0) / H))
    pe = jnp.zeros((max_seq_len, H), dtype=jnp.float32)
    pe = pe.at[:, 0::2].set(jnp.sin(position * div_term))
    pe = pe.at[:, 1::2].set(jnp.cos(position * div_term))

    k_emb, k_qkv, k_o, k_1, k_2 = jax.random.split(key, 5)
    # Big weights stored/streamed in bf16 (halved DMA). QKV fused as [H, 3H].
    w = lambda k, shape: (0.02 * jax.random.normal(k, shape, jnp.float32)).astype(jnp.bfloat16)

    return {
        "pos_enc": pe,                                                      # [max_seq, H]
        "time_emb": jax.random.normal(k_emb, (timesteps, H), jnp.float32),  # nn.Embedding ~N(0,1)
        "ln_alpha": jnp.ones((1, H), jnp.float32),
        "ln_beta": jnp.zeros((1, H), jnp.float32),
        "wqkv": w(k_qkv, (L, H, 3 * H)),
        "bqkv": jnp.zeros((L, 1, 3 * H), jnp.float32),
        "wo": w(k_o, (L, H, H)), "bo": jnp.zeros((L, 1, H), jnp.float32),
        "n1w": jnp.ones((L, 1, H), jnp.float32), "n1b": jnp.zeros((L, 1, H), jnp.float32),
        "w1": w(k_1, (L, H, FF)), "b1": jnp.zeros((L, 1, FF), jnp.float32),
        "w2": w(k_2, (L, FF, H)), "b2": jnp.zeros((L, 1, H), jnp.float32),
        "n2w": jnp.ones((L, 1, H), jnp.float32), "n2b": jnp.zeros((L, 1, H), jnp.float32),
    }


if __name__ == "__main__":
    # Small shapes consistent with the module (nhead=8, dim_feedforward=2048 hardcoded).
    B, S, H = 2, 8, 64
    NLAYERS, NHEAD, FF = 2, 8, 2048
    TIMESTEPS, MAX_SEQ = 1000, 512

    key = jax.random.PRNGKey(0)
    k_p, k_x, k_t = jax.random.split(key, 3)
    params = init_params(k_p, hidden_dim=H, timesteps=TIMESTEPS,
                         max_seq_len=MAX_SEQ, nlayers=NLAYERS, ff_dim=FF, nhead=NHEAD)

    x = jax.random.normal(k_x, (B, S, H), jnp.float32)          # [batch, seq, hidden]
    t = jax.random.randint(k_t, (B,), 0, TIMESTEPS)             # integer timesteps
    attention_mask = jnp.ones((B, S), jnp.float32)              # unused by the module's forward

    y, y_decoded = transformer_forward(x, t, attention_mask, params, nhead=NHEAD)
    jax.block_until_ready(y)
    assert y.shape == (B, S, H) and y_decoded is None
    assert bool(jnp.all(jnp.isfinite(y)))
    print("KERNEL_OK")
</pallas_src>

<mosaic_0001>
module attributes {stable_mosaic.version = 11 : i64} {
  func.func @_fused_layer_kernel(%arg0: i32, %arg1: i32, %arg2: memref<1x8x64xf32, #tpu.memory_space<vmem>>, %arg3: memref<8x64xf32, #tpu.memory_space<vmem>>, %arg4: memref<1x1x64xf32, #tpu.memory_space<vmem>>, %arg5: memref<1x64xf32, #tpu.memory_space<vmem>>, %arg6: memref<1x64xf32, #tpu.memory_space<vmem>>, %arg7: memref<1x64x192xbf16, #tpu.memory_space<vmem>>, %arg8: memref<1x1x192xf32, #tpu.memory_space<vmem>>, %arg9: memref<1x64x64xbf16, #tpu.memory_space<vmem>>, %arg10: memref<1x1x64xf32, #tpu.memory_space<vmem>>, %arg11: memref<1x1x64xf32, #tpu.memory_space<vmem>>, %arg12: memref<1x1x64xf32, #tpu.memory_space<vmem>>, %arg13: memref<1x64x2048xbf16, #tpu.memory_space<vmem>>, %arg14: memref<1x1x2048xf32, #tpu.memory_space<vmem>>, %arg15: memref<1x2048x64xbf16, #tpu.memory_space<vmem>>, %arg16: memref<1x1x64xf32, #tpu.memory_space<vmem>>, %arg17: memref<1x1x64xf32, #tpu.memory_space<vmem>>, %arg18: memref<1x1x64xf32, #tpu.memory_space<vmem>>, %arg19: memref<1x8x64xf32, #tpu.memory_space<vmem>>, %arg20: memref<1x64xf32, #tpu.memory_space<vmem>>) attributes {dimension_semantics = [#tpu.dimension_semantics<parallel>, #tpu.dimension_semantics<arbitrary>], iteration_bounds = array<i64: 2, 2>, scalar_prefetch = 0 : i64, scratch_operands = 1 : i64, tpu.core_type = #tpu.core_type<tc>, window_params = [{transform_indices = @transform_0, window_bounds = array<i64: 1, 8, 64>}, {pipeline_mode = #tpu.pipeline_mode<synchronous>, transform_indices = @transform_1, window_bounds = array<i64: 8, 64>}, {transform_indices = @transform_2, window_bounds = array<i64: 1, 1, 64>}, {pipeline_mode = #tpu.pipeline_mode<synchronous>, transform_indices = @transform_3, window_bounds = array<i64: 1, 64>}, {pipeline_mode = #tpu.pipeline_mode<synchronous>, transform_indices = @transform_4, window_bounds = array<i64: 1, 64>}, {transform_indices = @transform_5, window_bounds = array<i64: 1, 64, 192>}, {transform_indices = @transform_6, window_bounds = array<i64: 1, 1, 192>}, {transform_indices = @transform_7, window_bounds = array<i64: 1, 64, 64>}, {transform_indices = @transform_8, window_bounds = array<i64: 1, 1, 64>}, {transform_indices = @transform_9, window_bounds = array<i64: 1, 1, 64>}, {transform_indices = @transform_10, window_bounds = array<i64: 1, 1, 64>}, {transform_indices = @transform_11, window_bounds = array<i64: 1, 64, 2048>}, {transform_indices = @transform_12, window_bounds = array<i64: 1, 1, 2048>}, {transform_indices = @transform_13, window_bounds = array<i64: 1, 2048, 64>}, {transform_indices = @transform_14, window_bounds = array<i64: 1, 1, 64>}, {transform_indices = @transform_15, window_bounds = array<i64: 1, 1, 64>}, {transform_indices = @transform_16, window_bounds = array<i64: 1, 1, 64>}, {transform_indices = @transform_17, window_bounds = array<i64: 1, 8, 64>}]} {
    %c0_i32 = arith.constant 0 : i32
    %0 = arith.cmpi eq, %arg1, %c0_i32 : i32
    %1 = arith.extui %0 : i1 to i32
    %c0_i32_0 = arith.constant 0 : i32
    %2 = arith.cmpi ne, %1, %c0_i32_0 : i32
    scf.if %2 {
      %c0_63 = arith.constant 0 : index
      %c0_64 = arith.constant 0 : index
      %c0_65 = arith.constant 0 : index
      %177 = vector.load %arg2[%c0_63, %c0_64, %c0_65] : memref<1x8x64xf32, #tpu.memory_space<vmem>>, vector<1x8x64xf32>
      %178 = vector.shape_cast %177 : vector<1x8x64xf32> to vector<8x64xf32>
      %c0_66 = arith.constant 0 : index
      %c0_67 = arith.constant 0 : index
      %179 = vector.load %arg3[%c0_66, %c0_67] : memref<8x64xf32, #tpu.memory_space<vmem>>, vector<8x64xf32>
      %180 = arith.addf %178, %179 : vector<8x64xf32>
      %c0_68 = arith.constant 0 : index
      %c0_69 = arith.constant 0 : index
      %c0_70 = arith.constant 0 : index
      %181 = vector.load %arg19[%c0_68, %c0_69, %c0_70] : memref<1x8x64xf32, #tpu.memory_space<vmem>>, vector<1x8x64xf32>
      %182 = vector.shape_cast %181 : vector<1x8x64xf32> to vector<8x64xf32>
      %183 = vector.shape_cast %180 : vector<8x64xf32> to vector<1x8x64xf32>
      tpu.vector_store %arg19[%c0_68, %c0_69, %c0_70], %183 {strides = array<i32>} : memref<1x8x64xf32, #tpu.memory_space<vmem>>, vector<1x8x64xf32>,
      %c0_71 = arith.constant 0 : index
      %c0_72 = arith.constant 0 : index
      %c0_73 = arith.constant 0 : index
      %184 = vector.load %arg4[%c0_71, %c0_72, %c0_73] : memref<1x1x64xf32, #tpu.memory_space<vmem>>, vector<1x1x64xf32>
      %185 = vector.shape_cast %184 : vector<1x1x64xf32> to vector<1x64xf32>
      %cst_74 = arith.constant dense<0.000000e+00> : vector<1xf32>
      %186 = vector.multi_reduction <add>, %185, %cst_74 [1] : vector<1x64xf32> to vector<1xf32>
      %187 = vector.shape_cast %186 : vector<1xf32> to vector<1x1xf32>
      %cst_75 = arith.constant 6.400000e+01 : f32
      %188 = vector.broadcast %cst_75 : f32 to vector<1x1xf32>
      %189 = arith.divf %187, %188 : vector<1x1xf32>
      %190 = vector.broadcast %189 : vector<1x1xf32> to vector<1x64xf32>
      %191 = arith.subf %185, %190 : vector<1x64xf32>
      %192 = arith.mulf %191, %191 : vector<1x64xf32>
      %cst_76 = arith.constant dense<0.000000e+00> : vector<1xf32>
      %193 = vector.multi_reduction <add>, %192, %cst_76 [1] : vector<1x64xf32> to vector<1xf32>
      %194 = vector.shape_cast %193 : vector<1xf32> to vector<1x1xf32>
      %cst_77 = arith.constant 0.0158730168 : f32
      %195 = vector.broadcast %cst_77 : f32 to vector<1x1xf32>
      %196 = arith.mulf %194, %195 : vector<1x1xf32>
      %197 = math.sqrt %196 : vector<1x1xf32>
      %cst_78 = arith.constant 9.99999997E-7 : f32
      %198 = vector.broadcast %cst_78 : f32 to vector<1x1xf32>
      %199 = arith.addf %197, %198 : vector<1x1xf32>
      %c0_79 = arith.constant 0 : index
      %c0_80 = arith.constant 0 : index
      %200 = vector.load %arg5[%c0_79, %c0_80] : memref<1x64xf32, #tpu.memory_space<vmem>>, vector<1x64xf32>
      %201 = tpu.reciprocal %199 : vector<1x1xf32> -> vector<1x1xf32>
      %202 = vector.broadcast %201 : vector<1x1xf32> to vector<1x64xf32>
      %203 = arith.mulf %191, %202 : vector<1x64xf32>
      %c0_81 = arith.constant 0 : index
      %c0_82 = arith.constant 0 : index
      %204 = vector.load %arg6[%c0_81, %c0_82] : memref<1x64xf32, #tpu.memory_space<vmem>>, vector<1x64xf32>
      %205 = arith.addf %203, %204 : vector<1x64xf32>
      %206 = arith.mulf %200, %205 : vector<1x64xf32>
      %c0_83 = arith.constant 0 : index
      %c0_84 = arith.constant 0 : index
      %207 = vector.load %arg20[%c0_83, %c0_84] : memref<1x64xf32, #tpu.memory_space<vmem>>, vector<1x64xf32>
      tpu.vector_store %arg20[%c0_83, %c0_84], %206 {strides = array<i32>} : memref<1x64xf32, #tpu.memory_space<vmem>>, vector<1x64xf32>,
    } else {
    }
    %c0 = arith.constant 0 : index
    %c0_1 = arith.constant 0 : index
    %c0_2 = arith.constant 0 : index
    %3 = vector.load %arg19[%c0, %c0_1, %c0_2] : memref<1x8x64xf32, #tpu.memory_space<vmem>>, vector<1x8x64xf32>
    %4 = vector.shape_cast %3 : vector<1x8x64xf32> to vector<8x64xf32>
    %c0_3 = arith.constant 0 : index
    %c0_4 = arith.constant 0 : index
    %5 = vector.load %arg20[%c0_3, %c0_4] : memref<1x64xf32, #tpu.memory_space<vmem>>, vector<1x64xf32>
    %6 = arith.truncf %4 : vector<8x64xf32> to vector<8x64xbf16>
    %c0_5 = arith.constant 0 : index
    %c0_6 = arith.constant 0 : index
    %c0_7 = arith.constant 0 : index
    %7 = vector.load %arg7[%c0_5, %c0_6, %c0_7] : memref<1x64x192xbf16, #tpu.memory_space<vmem>>, vector<1x64x192xbf16>
    %8 = vector.shape_cast %7 : vector<1x64x192xbf16> to vector<64x192xbf16>
    %cst = arith.constant dense<0.000000e+00> : vector<8x192xf32>
    %9 = tpu.matmul %6, %8, %cst {dimension_numbers = #tpu.dot_dimension_numbers<[1], [0], [0], [1], [0, 0, 1, 1], [], []>} : vector<8x64xbf16>, vector<64x192xbf16>, vector<8x192xf32> -> vector<8x192xf32>
    %c0_8 = arith.constant 0 : index
    %c0_9 = arith.constant 0 : index
    %c0_10 = arith.constant 0 : index
    %10 = vector.load %arg8[%c0_8, %c0_9, %c0_10] : memref<1x1x192xf32, #tpu.memory_space<vmem>>, vector<1x1x192xf32>
    %11 = vector.shape_cast %10 : vector<1x1x192xf32> to vector<1x192xf32>
    %12 = vector.broadcast %11 : vector<1x192xf32> to vector<8x192xf32>
    %13 = arith.addf %9, %12 : vector<8x192xf32>
    %14 = vector.extract_strided_slice %13 {offsets = [0, 0], sizes = [8, 8], strides = [1, 1]} : vector<8x192xf32> to vector<8x8xf32>
    %15 = vector.extract_strided_slice %13 {offsets = [0, 8], sizes = [8, 8], strides = [1, 1]} : vector<8x192xf32> to vector<8x8xf32>
    %16 = vector.extract_strided_slice %13 {offsets = [0, 16], sizes = [8, 8], strides = [1, 1]} : vector<8x192xf32> to vector<8x8xf32>
    %17 = vector.extract_strided_slice %13 {offsets = [0, 24], sizes = [8, 8], strides = [1, 1]} : vector<8x192xf32> to vector<8x8xf32>
    %18 = vector.extract_strided_slice %13 {offsets = [0, 32], sizes = [8, 8], strides = [1, 1]} : vector<8x192xf32> to vector<8x8xf32>
    %19 = vector.extract_strided_slice %13 {offsets = [0, 40], sizes = [8, 8], strides = [1, 1]} : vector<8x192xf32> to vector<8x8xf32>
    %20 = vector.extract_strided_slice %13 {offsets = [0, 48], sizes = [8, 8], strides = [1, 1]} : vector<8x192xf32> to vector<8x8xf32>
    %21 = vector.extract_strided_slice %13 {offsets = [0, 56], sizes = [8, 8], strides = [1, 1]} : vector<8x192xf32> to vector<8x8xf32>
    %22 = vector.shape_cast %14 : vector<8x8xf32> to vector<1x8x8xf32>
    %23 = vector.shape_cast %15 : vector<8x8xf32> to vector<1x8x8xf32>
    %24 = vector.shape_cast %16 : vector<8x8xf32> to vector<1x8x8xf32>
    %25 = vector.shape_cast %17 : vector<8x8xf32> to vector<1x8x8xf32>
    %26 = vector.shape_cast %18 : vector<8x8xf32> to vector<1x8x8xf32>
    %27 = vector.shape_cast %19 : vector<8x8xf32> to vector<1x8x8xf32>
    %28 = vector.shape_cast %20 : vector<8x8xf32> to vector<1x8x8xf32>
    %29 = vector.shape_cast %21 : vector<8x8xf32> to vector<1x8x8xf32>
    %30 = tpu.concatenate %22, %23, %24, %25, %26, %27, %28, %29 in 0 : vector<1x8x8xf32>, vector<1x8x8xf32>, vector<1x8x8xf32>, vector<1x8x8xf32>, vector<1x8x8xf32>, vector<1x8x8xf32>, vector<1x8x8xf32>, vector<1x8x8xf32> -> vector<8x8x8xf32>
    %31 = vector.extract_strided_slice %13 {offsets = [0, 64], sizes = [8, 8], strides = [1, 1]} : vector<8x192xf32> to vector<8x8xf32>
    %32 = vector.extract_strided_slice %13 {offsets = [0, 72], sizes = [8, 8], strides = [1, 1]} : vector<8x192xf32> to vector<8x8xf32>
    %33 = vector.extract_strided_slice %13 {offsets = [0, 80], sizes = [8, 8], strides = [1, 1]} : vector<8x192xf32> to vector<8x8xf32>
    %34 = vector.extract_strided_slice %13 {offsets = [0, 88], sizes = [8, 8], strides = [1, 1]} : vector<8x192xf32> to vector<8x8xf32>
    %35 = vector.extract_strided_slice %13 {offsets = [0, 96], sizes = [8, 8], strides = [1, 1]} : vector<8x192xf32> to vector<8x8xf32>
    %36 = vector.extract_strided_slice %13 {offsets = [0, 104], sizes = [8, 8], strides = [1, 1]} : vector<8x192xf32> to vector<8x8xf32>
    %37 = vector.extract_strided_slice %13 {offsets = [0, 112], sizes = [8, 8], strides = [1, 1]} : vector<8x192xf32> to vector<8x8xf32>
    %38 = vector.extract_strided_slice %13 {offsets = [0, 120], sizes = [8, 8], strides = [1, 1]} : vector<8x192xf32> to vector<8x8xf32>
    %39 = vector.shape_cast %31 : vector<8x8xf32> to vector<1x8x8xf32>
    %40 = vector.shape_cast %32 : vector<8x8xf32> to vector<1x8x8xf32>
    %41 = vector.shape_cast %33 : vector<8x8xf32> to vector<1x8x8xf32>
    %42 = vector.shape_cast %34 : vector<8x8xf32> to vector<1x8x8xf32>
    %43 = vector.shape_cast %35 : vector<8x8xf32> to vector<1x8x8xf32>
    %44 = vector.shape_cast %36 : vector<8x8xf32> to vector<1x8x8xf32>
    %45 = vector.shape_cast %37 : vector<8x8xf32> to vector<1x8x8xf32>
    %46 = vector.shape_cast %38 : vector<8x8xf32> to vector<1x8x8xf32>
    %47 = tpu.concatenate %39, %40, %41, %42, %43, %44, %45, %46 in 0 : vector<1x8x8xf32>, vector<1x8x8xf32>, vector<1x8x8xf32>, vector<1x8x8xf32>, vector<1x8x8xf32>, vector<1x8x8xf32>, vector<1x8x8xf32>, vector<1x8x8xf32> -> vector<8x8x8xf32>
    %48 = vector.extract_strided_slice %13 {offsets = [0, 128], sizes = [8, 8], strides = [1, 1]} : vector<8x192xf32> to vector<8x8xf32>
    %49 = vector.extract_strided_slice %13 {offsets = [0, 136], sizes = [8, 8], strides = [1, 1]} : vector<8x192xf32> to vector<8x8xf32>
    %50 = vector.extract_strided_slice %13 {offsets = [0, 144], sizes = [8, 8], strides = [1, 1]} : vector<8x192xf32> to vector<8x8xf32>
    %51 = vector.extract_strided_slice %13 {offsets = [0, 152], sizes = [8, 8], strides = [1, 1]} : vector<8x192xf32> to vector<8x8xf32>
    %52 = vector.extract_strided_slice %13 {offsets = [0, 160], sizes = [8, 8], strides = [1, 1]} : vector<8x192xf32> to vector<8x8xf32>
    %53 = vector.extract_strided_slice %13 {offsets = [0, 168], sizes = [8, 8], strides = [1, 1]} : vector<8x192xf32> to vector<8x8xf32>
    %54 = vector.extract_strided_slice %13 {offsets = [0, 176], sizes = [8, 8], strides = [1, 1]} : vector<8x192xf32> to vector<8x8xf32>
    %55 = vector.extract_strided_slice %13 {offsets = [0, 184], sizes = [8, 8], strides = [1, 1]} : vector<8x192xf32> to vector<8x8xf32>
    %56 = vector.shape_cast %48 : vector<8x8xf32> to vector<1x8x8xf32>
    %57 = vector.shape_cast %49 : vector<8x8xf32> to vector<1x8x8xf32>
    %58 = vector.shape_cast %50 : vector<8x8xf32> to vector<1x8x8xf32>
    %59 = vector.shape_cast %51 : vector<8x8xf32> to vector<1x8x8xf32>
    %60 = vector.shape_cast %52 : vector<8x8xf32> to vector<1x8x8xf32>
    %61 = vector.shape_cast %53 : vector<8x8xf32> to vector<1x8x8xf32>
    %62 = vector.shape_cast %54 : vector<8x8xf32> to vector<1x8x8xf32>
    %63 = vector.shape_cast %55 : vector<8x8xf32> to vector<1x8x8xf32>
    %64 = tpu.concatenate %56, %57, %58, %59, %60, %61, %62, %63 in 0 : vector<1x8x8xf32>, vector<1x8x8xf32>, vector<1x8x8xf32>, vector<1x8x8xf32>, vector<1x8x8xf32>, vector<1x8x8xf32>, vector<1x8x8xf32>, vector<1x8x8xf32> -> vector<8x8x8xf32>
    "tpu.trace_start"() <{level = 10 : i32, message = "hqd,hkd->hqk"}> : () -> ()
    %cst_11 = arith.constant dense<0.000000e+00> : vector<8x8x8xf32>
    %65 = tpu.matmul %30, %47, %cst_11 {dimension_numbers = #tpu.dot_dimension_numbers<[2], [2], [1], [1], [0, 0, 0, 1, 1, 1], [0], [0]>} : vector<8x8x8xf32>, vector<8x8x8xf32>, vector<8x8x8xf32> -> vector<8x8x8xf32>
    "tpu.trace_stop"() : () -> ()
    %cst_12 = arith.constant 0.353553385 : f32
    %66 = vector.broadcast %cst_12 : f32 to vector<8x8x8xf32>
    %67 = arith.mulf %65, %66 : vector<8x8x8xf32>
    %cst_13 = arith.constant dense<0xFF800000> : vector<8x8xf32>
    %68 = vector.multi_reduction <maximumf>, %67, %cst_13 [2] : vector<8x8x8xf32> to vector<8x8xf32>
    %69 = vector.shape_cast %68 : vector<8x8xf32> to vector<8x8x1xf32>
    %70 = vector.broadcast %69 : vector<8x8x1xf32> to vector<8x8x8xf32>
    %71 = arith.subf %67, %70 : vector<8x8x8xf32>
    %72 = math.exp %71 : vector<8x8x8xf32>
    %cst_14 = arith.constant dense<0.000000e+00> : vector<8x8xf32>
    %73 = vector.multi_reduction <add>, %72, %cst_14 [2] : vector<8x8x8xf32> to vector<8x8xf32>
    %74 = vector.shape_cast %73 : vector<8x8xf32> to vector<8x8x1xf32>
    %75 = tpu.reciprocal %74 {approx = true} : vector<8x8x1xf32> -> vector<8x8x1xf32>
    %76 = vector.broadcast %75 : vector<8x8x1xf32> to vector<8x8x8xf32>
    %77 = arith.mulf %72, %76 : vector<8x8x8xf32>
    "tpu.trace_start"() <{level = 10 : i32, message = "hqk,hkd->hqd"}> : () -> ()
    %cst_15 = arith.constant dense<0.000000e+00> : vector<8x8x8xf32>
    %78 = tpu.matmul %77, %64, %cst_15 {dimension_numbers = #tpu.dot_dimension_numbers<[2], [1], [1], [2], [0, 0, 0, 1, 1, 2], [0], [0]>} : vector<8x8x8xf32>, vector<8x8x8xf32>, vector<8x8x8xf32> -> vector<8x8x8xf32>
    "tpu.trace_stop"() : () -> ()
    %79 = vector.extract_strided_slice %78 {offsets = [0, 0, 0], sizes = [1, 8, 8], strides = [1, 1, 1]} : vector<8x8x8xf32> to vector<1x8x8xf32>
    %80 = vector.shape_cast %79 : vector<1x8x8xf32> to vector<8x8xf32>
    %81 = vector.extract_strided_slice %78 {offsets = [1, 0, 0], sizes = [1, 8, 8], strides = [1, 1, 1]} : vector<8x8x8xf32> to vector<1x8x8xf32>
    %82 = vector.shape_cast %81 : vector<1x8x8xf32> to vector<8x8xf32>
    %83 = vector.extract_strided_slice %78 {offsets = [2, 0, 0], sizes = [1, 8, 8], strides = [1, 1, 1]} : vector<8x8x8xf32> to vector<1x8x8xf32>
    %84 = vector.shape_cast %83 : vector<1x8x8xf32> to vector<8x8xf32>
    %85 = vector.extract_strided_slice %78 {offsets = [3, 0, 0], sizes = [1, 8, 8], strides = [1, 1, 1]} : vector<8x8x8xf32> to vector<1x8x8xf32>
    %86 = vector.shape_cast %85 : vector<1x8x8xf32> to vector<8x8xf32>
    %87 = vector.extract_strided_slice %78 {offsets = [4, 0, 0], sizes = [1, 8, 8], strides = [1, 1, 1]} : vector<8x8x8xf32> to vector<1x8x8xf32>
    %88 = vector.shape_cast %87 : vector<1x8x8xf32> to vector<8x8xf32>
    %89 = vector.extract_strided_slice %78 {offsets = [5, 0, 0], sizes = [1, 8, 8], strides = [1, 1, 1]} : vector<8x8x8xf32> to vector<1x8x8xf32>
    %90 = vector.shape_cast %89 : vector<1x8x8xf32> to vector<8x8xf32>
    %91 = vector.extract_strided_slice %78 {offsets = [6, 0, 0], sizes = [1, 8, 8], strides = [1, 1, 1]} : vector<8x8x8xf32> to vector<1x8x8xf32>
    %92 = vector.shape_cast %91 : vector<1x8x8xf32> to vector<8x8xf32>
    %93 = vector.extract_strided_slice %78 {offsets = [7, 0, 0], sizes = [1, 8, 8], strides = [1, 1, 1]} : vector<8x8x8xf32> to vector<1x8x8xf32>
    %94 = vector.shape_cast %93 : vector<1x8x8xf32> to vector<8x8xf32>
    %95 = tpu.concatenate %80, %82, %84, %86, %88, %90, %92, %94 in 1 : vector<8x8xf32>, vector<8x8xf32>, vector<8x8xf32>, vector<8x8xf32>, vector<8x8xf32>, vector<8x8xf32>, vector<8x8xf32>, vector<8x8xf32> -> vector<8x64xf32>
    %96 = arith.truncf %95 : vector<8x64xf32> to vector<8x64xbf16>
    %c0_16 = arith.constant 0 : index
    %c0_17 = arith.constant 0 : index
    %c0_18 = arith.constant 0 : index
    %97 = vector.load %arg9[%c0_16, %c0_17, %c0_18] : memref<1x64x64xbf16, #tpu.memory_space<vmem>>, vector<1x64x64xbf16>
    %98 = vector.shape_cast %97 : vector<1x64x64xbf16> to vector<64x64xbf16>
    %cst_19 = arith.constant dense<0.000000e+00> : vector<8x64xf32>
    %99 = tpu.matmul %96, %98, %cst_19 {dimension_numbers = #tpu.dot_dimension_numbers<[1], [0], [0], [1], [0, 0, 1, 1], [], []>} : vector<8x64xbf16>, vector<64x64xbf16>, vector<8x64xf32> -> vector<8x64xf32>
    %c0_20 = arith.constant 0 : index
    %c0_21 = arith.constant 0 : index
    %c0_22 = arith.constant 0 : index
    %100 = vector.load %arg10[%c0_20, %c0_21, %c0_22] : memref<1x1x64xf32, #tpu.memory_space<vmem>>, vector<1x1x64xf32>
    %101 = vector.shape_cast %100 : vector<1x1x64xf32> to vector<1x64xf32>
    %102 = vector.broadcast %101 : vector<1x64xf32> to vector<8x64xf32>
    %103 = arith.addf %99, %102 : vector<8x64xf32>
    %104 = arith.addf %4, %103 : vector<8x64xf32>
    %c0_23 = arith.constant 0 : index
    %c0_24 = arith.constant 0 : index
    %c0_25 = arith.constant 0 : index
    %105 = vector.load %arg11[%c0_23, %c0_24, %c0_25] : memref<1x1x64xf32, #tpu.memory_space<vmem>>, vector<1x1x64xf32>
    %106 = vector.shape_cast %105 : vector<1x1x64xf32> to vector<1x64xf32>
    %c0_26 = arith.constant 0 : index
    %c0_27 = arith.constant 0 : index
    %c0_28 = arith.constant 0 : index
    %107 = vector.load %arg12[%c0_26, %c0_27, %c0_28] : memref<1x1x64xf32, #tpu.memory_space<vmem>>, vector<1x1x64xf32>
    %108 = vector.shape_cast %107 : vector<1x1x64xf32> to vector<1x64xf32>
    %cst_29 = arith.constant dense<0.000000e+00> : vector<8xf32>
    %109 = vector.multi_reduction <add>, %104, %cst_29 [1] : vector<8x64xf32> to vector<8xf32>
    %110 = vector.shape_cast %109 : vector<8xf32> to vector<8x1xf32>
    %cst_30 = arith.constant 6.400000e+01 : f32
    %111 = vector.broadcast %cst_30 : f32 to vector<8x1xf32>
    %112 = arith.divf %110, %111 : vector<8x1xf32>
    %113 = vector.broadcast %112 : vector<8x1xf32> to vector<8x64xf32>
    %114 = arith.subf %104, %113 : vector<8x64xf32>
    %115 = arith.mulf %114, %114 : vector<8x64xf32>
    %cst_31 = arith.constant dense<0.000000e+00> : vector<8xf32>
    %116 = vector.multi_reduction <add>, %115, %cst_31 [1] : vector<8x64xf32> to vector<8xf32>
    %117 = vector.shape_cast %116 : vector<8xf32> to vector<8x1xf32>
    %cst_32 = arith.constant 6.400000e+01 : f32
    %118 = vector.broadcast %cst_32 : f32 to vector<8x1xf32>
    %119 = arith.divf %117, %118 : vector<8x1xf32>
    %cst_33 = arith.constant 9.99999974E-6 : f32
    %120 = vector.broadcast %cst_33 : f32 to vector<8x1xf32>
    %121 = arith.addf %119, %120 : vector<8x1xf32>
    %122 = math.rsqrt %121 : vector<8x1xf32>
    %123 = vector.broadcast %122 : vector<8x1xf32> to vector<8x64xf32>
    %124 = arith.mulf %114, %123 : vector<8x64xf32>
    %125 = vector.broadcast %106 : vector<1x64xf32> to vector<8x64xf32>
    %126 = arith.mulf %124, %125 : vector<8x64xf32>
    %127 = vector.broadcast %108 : vector<1x64xf32> to vector<8x64xf32>
    %128 = arith.addf %126, %127 : vector<8x64xf32>
    %129 = arith.truncf %128 : vector<8x64xf32> to vector<8x64xbf16>
    %c0_34 = arith.constant 0 : index
    %c0_35 = arith.constant 0 : index
    %c0_36 = arith.constant 0 : index
    %130 = vector.load %arg13[%c0_34, %c0_35, %c0_36] : memref<1x64x2048xbf16, #tpu.memory_space<vmem>>, vector<1x64x2048xbf16>
    %131 = vector.shape_cast %130 : vector<1x64x2048xbf16> to vector<64x2048xbf16>
    %cst_37 = arith.constant dense<0.000000e+00> : vector<8x2048xf32>
    %132 = tpu.matmul %129, %131, %cst_37 {dimension_numbers = #tpu.dot_dimension_numbers<[1], [0], [0], [1], [0, 0, 1, 1], [], []>} : vector<8x64xbf16>, vector<64x2048xbf16>, vector<8x2048xf32> -> vector<8x2048xf32>
    %c0_38 = arith.constant 0 : index
    %c0_39 = arith.constant 0 : index
    %c0_40 = arith.constant 0 : index
    %133 = vector.load %arg14[%c0_38, %c0_39, %c0_40] : memref<1x1x2048xf32, #tpu.memory_space<vmem>>, vector<1x1x2048xf32>
    %134 = vector.shape_cast %133 : vector<1x1x2048xf32> to vector<1x2048xf32>
    %135 = vector.broadcast %134 : vector<1x2048xf32> to vector<8x2048xf32>
    %136 = arith.addf %132, %135 : vector<8x2048xf32>
    %cst_41 = arith.constant 0.000000e+00 : f32
    %137 = vector.broadcast %cst_41 : f32 to vector<8x2048xf32>
    %138 = arith.maximumf %136, %137 : vector<8x2048xf32>
    %139 = arith.truncf %138 : vector<8x2048xf32> to vector<8x2048xbf16>
    %c0_42 = arith.constant 0 : index
    %c0_43 = arith.constant 0 : index
    %c0_44 = arith.constant 0 : index
    %140 = vector.load %arg15[%c0_42, %c0_43, %c0_44] : memref<1x2048x64xbf16, #tpu.memory_space<vmem>>, vector<1x2048x64xbf16>
    %141 = vector.shape_cast %140 : vector<1x2048x64xbf16> to vector<2048x64xbf16>
    %cst_45 = arith.constant dense<0.000000e+00> : vector<8x64xf32>
    %142 = tpu.matmul %139, %141, %cst_45 {dimension_numbers = #tpu.dot_dimension_numbers<[1], [0], [0], [1], [0, 0, 1, 1], [], []>} : vector<8x2048xbf16>, vector<2048x64xbf16>, vector<8x64xf32> -> vector<8x64xf32>
    %c0_46 = arith.constant 0 : index
    %c0_47 = arith.constant 0 : index
    %c0_48 = arith.constant 0 : index
    %143 = vector.load %arg16[%c0_46, %c0_47, %c0_48] : memref<1x1x64xf32, #tpu.memory_space<vmem>>, vector<1x1x64xf32>
    %144 = vector.shape_cast %143 : vector<1x1x64xf32> to vector<1x64xf32>
    %145 = vector.broadcast %144 : vector<1x64xf32> to vector<8x64xf32>
    %146 = arith.addf %142, %145 : vector<8x64xf32>
    %147 = arith.addf %128, %146 : vector<8x64xf32>
    %c0_49 = arith.constant 0 : index
    %c0_50 = arith.constant 0 : index
    %c0_51 = arith.constant 0 : index
    %148 = vector.load %arg17[%c0_49, %c0_50, %c0_51] : memref<1x1x64xf32, #tpu.memory_space<vmem>>, vector<1x1x64xf32>
    %149 = vector.shape_cast %148 : vector<1x1x64xf32> to vector<1x64xf32>
    %c0_52 = arith.constant 0 : index
    %c0_53 = arith.constant 0 : index
    %c0_54 = arith.constant 0 : index
    %150 = vector.load %arg18[%c0_52, %c0_53, %c0_54] : memref<1x1x64xf32, #tpu.memory_space<vmem>>, vector<1x1x64xf32>
    %151 = vector.shape_cast %150 : vector<1x1x64xf32> to vector<1x64xf32>
    %cst_55 = arith.constant dense<0.000000e+00> : vector<8xf32>
    %152 = vector.multi_reduction <add>, %147, %cst_55 [1] : vector<8x64xf32> to vector<8xf32>
    %153 = vector.shape_cast %152 : vector<8xf32> to vector<8x1xf32>
    %cst_56 = arith.constant 6.400000e+01 : f32
    %154 = vector.broadcast %cst_56 : f32 to vector<8x1xf32>
    %155 = arith.divf %153, %154 : vector<8x1xf32>
    %156 = vector.broadcast %155 : vector<8x1xf32> to vector<8x64xf32>
    %157 = arith.subf %147, %156 : vector<8x64xf32>
    %158 = arith.mulf %157, %157 : vector<8x64xf32>
    %cst_57 = arith.constant dense<0.000000e+00> : vector<8xf32>
    %159 = vector.multi_reduction <add>, %158, %cst_57 [1] : vector<8x64xf32> to vector<8xf32>
    %160 = vector.shape_cast %159 : vector<8xf32> to vector<8x1xf32>
    %cst_58 = arith.constant 6.400000e+01 : f32
    %161 = vector.broadcast %cst_58 : f32 to vector<8x1xf32>
    %162 = arith.divf %160, %161 : vector<8x1xf32>
    %cst_59 = arith.constant 9.99999974E-6 : f32
    %163 = vector.broadcast %cst_59 : f32 to vector<8x1xf32>
    %164 = arith.addf %162, %163 : vector<8x1xf32>
    %165 = math.rsqrt %164 : vector<8x1xf32>
    %166 = vector.broadcast %165 : vector<8x1xf32> to vector<8x64xf32>
    %167 = arith.mulf %157, %166 : vector<8x64xf32>
    %168 = vector.broadcast %149 : vector<1x64xf32> to vector<8x64xf32>
    %169 = arith.mulf %167, %168 : vector<8x64xf32>
    %170 = vector.broadcast %151 : vector<1x64xf32> to vector<8x64xf32>
    %171 = arith.addf %169, %170 : vector<8x64xf32>
    %172 = vector.broadcast %5 : vector<1x64xf32> to vector<8x64xf32>
    %173 = arith.addf %171, %172 : vector<8x64xf32>
    %c0_60 = arith.constant 0 : index
    %c0_61 = arith.constant 0 : index
    %c0_62 = arith.constant 0 : index
    %174 = vector.load %arg19[%c0_60, %c0_61, %c0_62] : memref<1x8x64xf32, #tpu.memory_space<vmem>>, vector<1x8x64xf32>
    %175 = vector.shape_cast %174 : vector<1x8x64xf32> to vector<8x64xf32>
    %176 = vector.shape_cast %173 : vector<8x64xf32> to vector<1x8x64xf32>
    tpu.vector_store %arg19[%c0_60, %c0_61, %c0_62], %176 {strides = array<i32>} : memref<1x8x64xf32, #tpu.memory_space<vmem>>, vector<1x8x64xf32>,
    return
  }
  func.func @transform_0(%arg0: i32, %arg1: i32) -> (i32, i32, i32) {
    %c0_i32 = arith.constant 0 : i32
    %c0_i32_0 = arith.constant 0 : i32
    %c0_i32_1 = arith.constant 0 : i32
    return %arg0, %c0_i32, %c0_i32_0 : i32, i32, i32
  }
  func.func @transform_1(%arg0: i32, %arg1: i32) -> (i32, i32) {
    %c0_i32 = arith.constant 0 : i32
    %c0_i32_0 = arith.constant 0 : i32
    %c0_i32_1 = arith.constant 0 : i32
    return %c0_i32, %c0_i32_0 : i32, i32
  }
  func.func @transform_2(%arg0: i32, %arg1: i32) -> (i32, i32, i32) {
    %c0_i32 = arith.constant 0 : i32
    %c0_i32_0 = arith.constant 0 : i32
    %c0_i32_1 = arith.constant 0 : i32
    return %arg0, %c0_i32, %c0_i32_0 : i32, i32, i32
  }
  func.func @transform_3(%arg0: i32, %arg1: i32) -> (i32, i32) {
    %c0_i32 = arith.constant 0 : i32
    %c0_i32_0 = arith.constant 0 : i32
    %c0_i32_1 = arith.constant 0 : i32
    return %c0_i32, %c0_i32_0 : i32, i32
  }
  func.func @transform_4(%arg0: i32, %arg1: i32) -> (i32, i32) {
    %c0_i32 = arith.constant 0 : i32
    %c0_i32_0 = arith.constant 0 : i32
    %c0_i32_1 = arith.constant 0 : i32
    return %c0_i32, %c0_i32_0 : i32, i32
  }
  func.func @transform_5(%arg0: i32, %arg1: i32) -> (i32, i32, i32) {
    %c0_i32 = arith.constant 0 : i32
    %c0_i32_0 = arith.constant 0 : i32
    %c0_i32_1 = arith.constant 0 : i32
    return %arg1, %c0_i32, %c0_i32_0 : i32, i32, i32
  }
  func.func @transform_6(%arg0: i32, %arg1: i32) -> (i32, i32, i32) {
    %c0_i32 = arith.constant 0 : i32
    %c0_i32_0 = arith.constant 0 : i32
    %c0_i32_1 = arith.constant 0 : i32
    return %arg1, %c0_i32, %c0_i32_0 : i32, i32, i32
  }
  func.func @transform_7(%arg0: i32, %arg1: i32) -> (i32, i32, i32) {
    %c0_i32 = arith.constant 0 : i32
    %c0_i32_0 = arith.constant 0 : i32
    %c0_i32_1 = arith.constant 0 : i32
    return %arg1, %c0_i32, %c0_i32_0 : i32, i32, i32
  }
  func.func @transform_8(%arg0: i32, %arg1: i32) -> (i32, i32, i32) {
    %c0_i32 = arith.constant 0 : i32
    %c0_i32_0 = arith.constant 0 : i32
    %c0_i32_1 = arith.constant 0 : i32
    return %arg1, %c0_i32, %c0_i32_0 : i32, i32, i32
  }
  func.func @transform_9(%arg0: i32, %arg1: i32) -> (i32, i32, i32) {
    %c0_i32 = arith.constant 0 : i32
    %c0_i32_0 = arith.constant 0 : i32
    %c0_i32_1 = arith.constant 0 : i32
    return %arg1, %c0_i32, %c0_i32_0 : i32, i32, i32
  }
  func.func @transform_10(%arg0: i32, %arg1: i32) -> (i32, i32, i32) {
    %c0_i32 = arith.constant 0 : i32
    %c0_i32_0 = arith.constant 0 : i32
    %c0_i32_1 = arith.constant 0 : i32
    return %arg1, %c0_i32, %c0_i32_0 : i32, i32, i32
  }
  func.func @transform_11(%arg0: i32, %arg1: i32) -> (i32, i32, i32) {
    %c0_i32 = arith.constant 0 : i32
    %c0_i32_0 = arith.constant 0 : i32
    %c0_i32_1 = arith.constant 0 : i32
    return %arg1, %c0_i32, %c0_i32_0 : i32, i32, i32
  }
  func.func @transform_12(%arg0: i32, %arg1: i32) -> (i32, i32, i32) {
    %c0_i32 = arith.constant 0 : i32
    %c0_i32_0 = arith.constant 0 : i32
    %c0_i32_1 = arith.constant 0 : i32
    return %arg1, %c0_i32, %c0_i32_0 : i32, i32, i32
  }
  func.func @transform_13(%arg0: i32, %arg1: i32) -> (i32, i32, i32) {
    %c0_i32 = arith.constant 0 : i32
    %c0_i32_0 = arith.constant 0 : i32
    %c0_i32_1 = arith.constant 0 : i32
    return %arg1, %c0_i32, %c0_i32_0 : i32, i32, i32
  }
  func.func @transform_14(%arg0: i32, %arg1: i32) -> (i32, i32, i32) {
    %c0_i32 = arith.constant 0 : i32
    %c0_i32_0 = arith.constant 0 : i32
    %c0_i32_1 = arith.constant 0 : i32
    return %arg1, %c0_i32, %c0_i32_0 : i32, i32, i32
  }
  func.func @transform_15(%arg0: i32, %arg1: i32) -> (i32, i32, i32) {
    %c0_i32 = arith.constant 0 : i32
    %c0_i32_0 = arith.constant 0 : i32
    %c0_i32_1 = arith.constant 0 : i32
    return %arg1, %c0_i32, %c0_i32_0 : i32, i32, i32
  }
  func.func @transform_16(%arg0: i32, %arg1: i32) -> (i32, i32, i32) {
    %c0_i32 = arith.constant 0 : i32
    %c0_i32_0 = arith.constant 0 : i32
    %c0_i32_1 = arith.constant 0 : i32
    return %arg1, %c0_i32, %c0_i32_0 : i32, i32, i32
  }
  func.func @transform_17(%arg0: i32, %arg1: i32) -> (i32, i32, i32) {
    %c0_i32 = arith.constant 0 : i32
    %c0_i32_0 = arith.constant 0 : i32
    %c0_i32_1 = arith.constant 0 : i32
    return %arg0, %c0_i32, %c0_i32_0 : i32, i32, i32
  }
}

</mosaic_0001>

<bundles_post_ra>
// kernel: tpu_custom_call.1
= control target key start
LH: loop header
LB: loop body
LE: loop exit
PB: predicated region body
PF: predicated region fallthrough
CT: control target
= control target key end

     0   :  { %s5834_s0 = inlined_call_operand.vmem [shape: f32[2,8,64], index: 0, kind: input, shape index: {}]   ;;  %s5835_s1 = inlined_call_operand.vmem [shape: f32[8,64], index: 1, kind: input, shape index: {}]   ;;  %s5836_s2 = inlined_call_operand.vmem [shape: f32[2,1,64], index: 2, kind: input, shape index: {}]   ;;  %s5837_s3 = inlined_call_operand.vmem [shape: f32[1,64], index: 3, kind: input, shape index: {}]   ;;  %s5838_s4 = inlined_call_operand.vmem [shape: f32[1,64], index: 4, kind: input, shape index: {}]   ;;  %s5839_s5 = inlined_call_operand.vmem [shape: bf16[2,64,192], index: 5, kind: input, shape index: {}]   ;;  %s5840_s6 = inlined_call_operand.vmem [shape: f32[2,1,192], index: 6, kind: input, shape index: {}]   ;;  %s5841_s7 = inlined_call_operand.vmem [shape: bf16[2,64,64], index: 7, kind: input, shape index: {}]   ;;  %s5842_s8 = inlined_call_operand.vmem [shape: f32[2,1,64], index: 8, kind: input, shape index: {}]   ;;  %s5843_s9 = inlined_call_operand.vmem [shape: f32[2,1,64], index: 9, kind: input, shape index: {}]   ;;  %s5844_s10 = inlined_call_operand.vmem [shape: f32[2,1,64], index: 10, kind: input, shape index: {}]   ;;  %s5845_s11 = inlined_call_operand.vmem [shape: bf16[2,64,2048], index: 11, kind: input, shape index: {}]   ;;  %s5846_s12 = inlined_call_operand.vmem [shape: f32[2,1,2048], index: 12, kind: input, shape index: {}]   ;;  %s5847_s13 = inlined_call_operand.vmem [shape: bf16[2,2048,64], index: 13, kind: input, shape index: {}]   ;;  %s5848_s14 = inlined_call_operand.vmem [shape: f32[2,1,64], index: 14, kind: input, shape index: {}]   ;;  %s5849_s15 = inlined_call_operand.vmem [shape: f32[2,1,64], index: 15, kind: input, shape index: {}]   ;;  %s5850_s16 = inlined_call_operand.vmem [shape: f32[2,1,64], index: 16, kind: input, shape index: {}]   ;;  %s5851_s17 = inlined_call_operand.hbm [shape: f32[2,8,64], index: 17, kind: output, shape index: {}]  }
   0x1   :  { %5868 = sst [smem:[#allocation21_spill]] %s5834_s0 }
   0x2   :  { %5869 = sst [smem:[#allocation22_spill]] %s5835_s1 }
   0x3   :  { %5870 = sst [smem:[#allocation23_spill]] %s5836_s2 }
   0x4   :  { %5871 = sst [smem:[#allocation24_spill]] %s5837_s3 }
   0x5   :  { %5872 = sst [smem:[#allocation25_spill]] %s5838_s4 }
   0x6   :  { %5873 = sst [smem:[#allocation26_spill]] %s5839_s5 }
   0x7   :  { %5874 = sst [smem:[#allocation27_spill]] %s5840_s6 }
   0x8   :  { %5875 = sst [smem:[#allocation28_spill]] %s5841_s7 }
   0x9   :  { %5876 = sst [smem:[#allocation29_spill]] %s5851_s17 }
   0xa   :  { %22 = vsyncpa [#allocation4], 0 }
   0xb   :  { %24 = vsyncpa [#allocation4 + $0x1], 0  ;;  %s5167_s24 = smov 0   ;;  %s5169_s25 = smov 0  }
   0xc   :  { %s5171_s26 = smov 0   ;;  %s5173_s27 = smov 0  }
   0xd   :  { %s5175_s28 = smov 0   ;;  %s5177_s29 = smov 0  }
   0xe   :  { %s5179_s0 = smov 0   ;;  %s5181_s30 = smov 0  }
   0xf LB: > { %5877 = sst [smem:[#allocation6_spill]] %s5030_s24  ;;  %s3736_s18 = sadd.s32 4294967295, %s5058_s30   ;;  %s5058_s30 = sphi %s5181_s30, %s30_s30   ;;  %s5054_s0 = sphi %s5179_s0, %s5922_s0   ;;  %s5050_s29 = sphi %s5177_s29, %s5921_s29   ;;  %s5046_s28 = sphi %s5175_s28, %s5920_s28   ;;  %s5042_s27 = sphi %s5173_s27, %s5919_s27   ;;  %s5038_s26 = sphi %s5171_s26, %s5918_s26   ;;  %s5034_s25 = sphi %s5169_s25, %s5917_s25   ;;  %s5030_s24 = sphi %s5167_s24, %s5916_s24  }
  0x10   : > { %5878 = sst [smem:[#allocation7_spill]] %s5034_s25  ;;  %s3737_s19 = sadd.s32 4294967294, %s5058_s30  }
  0x11   : > { %5879 = sst [smem:[#allocation8_spill]] %s5038_s26  ;;  %s39_s1 = sadd.s32 1, %s5050_s29 }
  0x12   : > { %5880 = sst [smem:[#allocation9_spill]] %s5042_s27  ;;  %p40_p0 = scmp.ge.s32.totalorder %s39_s1, 2 }
  0x13   : > { %5881 = sst [smem:[#allocation10_spill]] %s5046_s28  ;;  %s42_s20 = sadd.s32 1, %s5054_s0 }
  0x14   : > { %5882 = sst [smem:[#allocation11_spill]] %s5050_s29  ;;  %p486_p1 = scmp.ne.s32.totalorder %s5038_s26, %s5034_s25 }
  0x15   : > { %5883 = sst [smem:[#allocation12_spill]] %s5054_s0  ;;  %p487_p2 = scmp.eq.s32.totalorder %s3736_s18, 3 }
  0x16   : > { %5884 = sst [smem:[#allocation13_spill]] %s5058_s30  ;;  %s5924_s1 = smov (%p40_p0, %s39_s1), 0 }
  0x17   : > { %5885 = sst [smem:[#allocation14_spill]] %s5924_s1  ;;  %s5926_s20 = smov (!%p40_p0, %s42_s20), %s5054_s0 }
  0x18   : > { %p5216_p3 = por %p487_p2, %p486_p1  ;;  %p492_p4 = scmp.ne.s32.totalorder %s5034_s25, %s5030_s24 }
  0x19   : > { %p44_p5 = scmp.ge.s32.totalorder %s5926_s20, 2  ;;  %p493_p6 = scmp.eq.s32.totalorder %s3737_s19, 3 }
  0x1a   : > { %s5886_s21 = scalar_select %p5216_p3, 1, 0 }
  0x1b   : > { %p3740_p7 = scmp.ge.s32.totalorder %s5058_s30, 1  ;;  %p615_p8 = scmp.lt.s32.totalorder %s5058_s30, 5 }
  0x1c   : > { %5887 = sst [smem:[#allocation15_spill]] %s5886_s21  ;;  %s5928_s20 = smov (%p44_p5, %s5926_s20), 0 }
  0x1d   : > { %5888 = sst [smem:[#allocation16_spill]] %s5928_s20  ;;  %p5226_p9 = por %p493_p6, %p492_p4 }
  0x1e   : > { %p616_p10 = pnand %p3740_p7, %p615_p8  ;;  %s473_s23 = ssub.s32 %s5054_s0, %s5928_s20 }
  0x1f   : > { %s5889_s22 = scalar_select %p5226_p9, 1, 0 }
  0x20   : > { %s476_s18 = sadd.s32 1, %s5038_s26  ;;  %p474_p11 = scmp.eq.s32.totalorder %s473_s23, 0 }
  0x21   : > { %5890 = sst [smem:[#allocation17_spill]] %s5889_s22  ;;  %619 = sbr.rel (%p616_p10) target bundleno = 2431 (0x97f), region = 88 }
  0x22   : > { %s5234_s1 = scalar_select %p474_p11, %s5038_s26, %s476_s18  }
  0x24   : > { %5891 = sst [smem:[#allocation18_spill]] %s5234_s1 }
  0x26   : > { %s5857_s19 = sand.u32 1, %s5034_s25   ;;  %p715_p12 = scmp.lt.s32.totalorder %s5046_s28, 1 }
  0x27   : > { %s3741_s29 = sshll.u32 %s5857_s19, 3  ;;  %p722_p13 = scmp.lt.s32.totalorder %s5042_s27, 1 }
  0x28   : > { %s716_s24 = scalar_select %p715_p12, %s5046_s28, 1 }
  0x29   : > { %s5243_s22 = scalar_select %p722_p13, %s5042_s27, 1 }
  0x2a   : > { %s3742_s23 = sshll.u32 %s716_s24, 3  ;;  %s5892_s2 = sld [smem:[#allocation23_spill]] }
  0x2b   : > { %s5893_s26 = sld [smem:[#allocation21_spill]]  ;;  %s4617_s21 = sshll.u32 %s5243_s22, 6 }
  0x2c   : > { %s5894_s5 = sld [smem:[#allocation26_spill]]  ;;  %s3745_s3 = sshll.u32 %s5243_s22, 1 }
  0x2d   : > { %s5896_s6 = sld [smem:[#allocation27_spill]]  ;;  %s3750_s27 = sshll.u32 %s5243_s22, 4 }
  0x2e   : > { %s5898_s7 = sld [smem:[#allocation28_spill]]  ;;  %s5293_s19 = scalar_lea.vmem %s5846_s12, %s3750_s27 }
  0x2f   : > { %s5313_s27 = scalar_lea.vmem [#allocation3], %s3741_s29  ;;  %s5899_s1 = sld [smem:[#allocation9_spill]] }
  0x30   : > { %s721_s0 = scalar_lea.vmem %s5892_s2, %s716_s24  ;;  %s4618_s24 = sshll.u32 %s5243_s22, 5 }
  0x31   : > { %s5251_s30 = scalar_lea.vmem %s5893_s26, %s3742_s23  ;;  %s4620_s23 = sshll.u32 %s5243_s22, 10 }
  0x32   : > { %s5257_s28 = scalar_lea.vmem %s5894_s5, %s4617_s21  ;;  %s761_s21 = scalar_lea.vmem %s5848_s14, %s5243_s22 }
  0x33   : > { %5895 = sst [smem:[#allocation19_spill]] %s5257_s28  ;;  %s5263_s20 = scalar_lea.vmem %s5896_s6, %s3745_s3 }
  0x34   : > { %5897 = sst [smem:[#allocation20_spill]] %s5263_s20  ;;  %s5269_s26 = scalar_lea.vmem %s5898_s7, %s4618_s24 }
  0x35   : > { %s4619_s3 = sshll.u32 %s5243_s22, 9  ;;  %s5303_s28 = scalar_lea.vmem %s5847_s13, %s4620_s23 }
  0x36   : > { %s5288_s18 = scalar_lea.vmem %s5845_s11, %s4619_s3  ;;  %s764_s6 = scalar_lea.vmem %s5849_s15, %s5243_s22 }
  0x37   : > { %s767_s24 = scalar_lea.vmem %s5850_s16, %s5243_s22  ;;  %p3753_p0 = scmp.ne.s32.totalorder %s5899_s1, 0 }
  0x38   : > { %s5900_s29 = sld [smem:[#allocation22_spill]] (!%p3753_p0) }
  0x39   : > { %772 = sbr.rel (%p3753_p0) target bundleno = 352 (0x160), region = 92  ;;  %s5901_s17 = sld [smem:[#allocation25_spill]] (!%p3753_p0) }
  0x3a   : > { %s5902_s25 = sld [smem:[#allocation24_spill]] (!%p3753_p0) }
  0x3e   : > { %v778_v0 = vld [vmem:[%s721_s0] sm:$0x1]  ;;  %vm779_vm0 = vcmask 516096   ;;  %v5060_v2 = vmov 64.0   ;;  %vm776_vm2 = vcmask 523264  }
  0x3f   : > { %v780_v1 = vsel %vm779_vm0, %v778_v0, 0.0  ;;  %4913 = vrcp.f32 %v5060_v2  ;;  %v773_v20 = vld [vmem:[%s5251_s30] sm:$0xff] }
  0x40   : > { %781 = vadd.xlane.f32.xlu0 %v780_v1  ;;  %v774_v21 = vld [vmem:[%s5900_s29] sm:$0xff] }
  0x41   : > { %v775_v22 = vadd.f32 %v774_v21, %v773_v20  ;;  %v826_v39 = vld [vmem:[%s5901_s17] sm:$0x1] }
  0x42   : > { %v810_v42 = vld [vmem:[%s5902_s25] sm:$0x1] }
  0x43   : > { %777 = vst.msk [vmem:[%s5313_s27] sm:$0xff] %vm776_vm2, %v775_v22 }
  0x45   : > { %v4914_v3 = vpop.eup %4913 }
  0x46   : > { %v784_v4 = vmul.f32 64.0, %v4914_v3  ;;  %vm788_vm1 = vweird.f32 %v4914_v3 }
  0x48   : > { %v785_v5 = vsub.f32 1.0, %v784_v4 }
  0x4a   : > { %v786_v6 = vmul.f32 %v4914_v3, %v785_v5 }
  0x4c   : > { %v787_v7 = vadd.f32 %v4914_v3, %v786_v6 }
  0x4e   : > { %v789_v8 = vsel %vm788_vm1, %v4914_v3, %v787_v7 }
  0xb3   : > { %v782_v9 = vpop.xlane.xlu0 %781 }
  0xb4   : > { %v790_v10 = vmul.f32 %v789_v8, %v782_v9 }
  0xb6   : > { %v791_v11 = vsub.f32 %v778_v0, %v790_v10 }
  0xb8   : > { %v792_v12 = vmul.f32 %v791_v11, %v791_v11 }
  0xba   : > { %v793_v13 = vsel %vm779_vm0, %v792_v12, 0.0 }
  0xbb   : > { %794 = vadd.xlane.f32.xlu0 %v793_v13 }
 0x12e   : > { %v795_v14 = vpop.xlane.xlu0 %794 }
 0x12f   : > { %v796_v15 = vmul.f32 0.015873017, %v795_v14 }
 0x131   : > { %4915 = vrsqrt.f32 %v796_v15  ;;  %vm804_vm3 = vcmp.eq.f32.partialorder %v796_v15, inf  ;;  %v807_v26 = vand.u32 2147483648, %v796_v15  ;;  %vm806_vm4 = vcmp.eq.f32.partialorder %v796_v15, 0.0 }
 0x137   : > { %v4916_v16 = vpop.eup %4915 }
 0x138   : > { %v798_v17 = vmul.f32 %v4916_v16, %v796_v15 }
 0x13a   : > { %v799_v18 = vmul.f32 %v4916_v16, %v798_v17 }
 0x13c   : > { %v800_v19 = vmul.f32 0.5, %v799_v18 }
 0x13e   : > { %v801_v23 = vsub.f32 1.5, %v800_v19 }
 0x140   : > { %v802_v24 = vmul.f32 %v4916_v16, %v801_v23 }
 0x142   : > { %v803_v25 = vmul.f32 %v802_v24, %v796_v15 }
 0x144   : > { %v805_v27 = vsel %vm804_vm3, %v796_v15, %v803_v25 }
 0x145   : > { %v808_v28 = vsel %vm806_vm4, %v807_v26, %v805_v27 }
 0x146   : > { %v809_v29 = vadd.f32 1e-06, %v808_v28 }
 0x148   : > { %4917 = vrcp.f32 %v809_v29  ;;  %v822_v33 = vand.u32 2147483648, %v809_v29  ;;  %v820_v35 = vand.u32 2147483647, %v809_v29  ;;  %vm816_vm6 = vweird.f32 %v809_v29 }
 0x14a   : > { %v823_v37 = vor.u32 1.1754944e-38, %v822_v33  ;;  %vm821_vm8 = vcmp.eq.f32.partialorder %v820_v35, 8.507059e+37 }
 0x14e   : > { %v4918_v30 = vpop.eup %4917 }
 0x14f   : > { %v812_v31 = vmul.f32 %v4918_v30, %v809_v29  ;;  %vm817_vm5 = vweird.f32 %v4918_v30 }
 0x150   : > { %vm818_vm7 = vmor %vm816_vm6, %vm817_vm5 }
 0x151   : > { %v813_v32 = vsub.f32 1.0, %v812_v31 }
 0x153   : > { %v814_v34 = vmul.f32 %v4918_v30, %v813_v32 }
 0x155   : > { %v815_v36 = vadd.f32 %v4918_v30, %v814_v34 }
 0x157   : > { %v819_v38 = vsel %vm818_vm7, %v4918_v30, %v815_v36 }
 0x158   : > { %v824_v40 = vsel %vm821_vm8, %v823_v37, %v819_v38 }
 0x159   : > { %v825_v41 = vmul.f32 %v824_v40, %v791_v11 }
 0x15b   : > { %v827_v43 = vadd.f32 %v826_v39, %v825_v41 }
 0x15d   : > { %v828_v44 = vmul.f32 %v827_v43, %v810_v42 }
 0x15f   : > { %829 = vst.msk [vmem:[#allocation2] sm:$0x1] %vm779_vm0, %v828_v44 }
 0x160 PF: > { %s5903_s5 = sld [smem:[#allocation19_spill]]  ;;  %v5339_v57 = vld [vmem:[%s5313_s27] sm:$0xff]  ;;  %vm887_vm9 = vcmask 523264   ;;  %s5061_s3 = smov 88   ;;  %vm956_vm10 = vcmask 64512   ;;  %vm1472_vm11 = vcmask 130048  }
 0x161   : > { %s5904_s20 = sld [smem:[#allocation20_spill]]  ;;  %v832_v58 = vpack.c.bf16 %v5339_v57, %v5339_v57  ;;  %s5062_s1 = smov 104   ;;  %vm1474_vm12 = vcmask 195584   ;;  %vm1476_vm13 = vcmask 261120   ;;  %vm1478_vm14 = vcmask 326656  }
 0x162   : > { %s5063_s2 = smov 120   ;;  %s5064_s7 = smov 80   ;;  %vm1480_vm15 = vcmask 392192   ;;  %vm1482_vm0 = vcmask 457728  }
 0x163   : > { %s5065_s29 = smov 96   ;;  %s5066_s0 = smov 112  }
 0x164   : > { %s5067_s30 = smov 64   ;;  %s5068_s17 = smov 72  }
 0x165   : > { %s5069_s4 = smov 8   ;;  %s5070_s23 = smov 24  }
 0x166   : > { %v3780_v45 = vld [vmem:[%s5903_s5 + $0x30] sm:$0xf]  ;;  %v4628_v46 = vld [vmem:[%s5903_s5 + $0x34] sm:$0xf0]  ;;  %v3772_v47 = vld [vmem:[%s5903_s5 + $0x20] sm:$0xf] }
 0x167   : > { %v3781_v48 = vor.u32 %v4628_v46, %v3780_v45  ;;  %v4626_v49 = vld [vmem:[%s5903_s5 + $0x24] sm:$0xf0]  ;;  %v3764_v51 = vld [vmem:[%s5903_s5 + $0x10] sm:$0xf]  ;;  %v4624_v52 = vld [vmem:[%s5903_s5 + $0x14] sm:$0xf0] }
 0x168   : > { %v3773_v50 = vor.u32 %v4626_v49, %v3772_v47  ;;  %v3765_v53 = vor.u32 %v4624_v52, %v3764_v51  ;;  %v3756_v54 = vld [vmem:[%s5903_s5] sm:$0xf]  ;;  %v4622_v55 = vld [vmem:[%s5903_s5 + $0x4] sm:$0xf0]  ;;  %v4627_v59 = vld [vmem:[%s5903_s5 + $0x34] sm:$0xf] }
 0x169   : > { %895 = vmatpush.bf16.msra.mxu0 %v3781_v48  ;;  %v3757_v56 = vor.u32 %v4622_v55, %v3756_v54  ;;  %v3782_v60 = vld [vmem:[%s5903_s5 + $0x38] sm:$0xf0]  ;;  %v4625_v61 = vld [vmem:[%s5903_s5 + $0x24] sm:$0xf]  ;;  %v3774_v63 = vld [vmem:[%s5903_s5 + $0x28] sm:$0xf0] }
 0x16a   : > { %v3785_v62 = vor.u32 %v4627_v59, %v3782_v60  ;;  %v3777_v0 = vor.u32 %v4625_v61, %v3774_v63  ;;  %v4623_v1 = vld [vmem:[%s5903_s5 + $0x14] sm:$0xf]  ;;  %v3766_v2 = vld [vmem:[%s5903_s5 + $0x18] sm:$0xf0]  ;;  %v841_v3 = vld [vmem:[%s5904_s20] sm:$0x3] }
 0x16b   : > { %v3769_v4 = vor.u32 %v4623_v1, %v3766_v2  ;;  %v843_v5 = vperm.slane %v841_v3, 0  ;;  %v4621_v9 = vld [vmem:[%s5903_s5 + $0x4] sm:$0xf]  ;;  %v3758_v10 = vld [vmem:[%s5903_s5 + $0x8] sm:$0xf0]  ;;  %v844_v20 = vperm.slane %v841_v3, 1 }
 0x16c   : > { %908 = vmatpush.bf16.msra.mxu1 %v3785_v62  ;;  %v3761_v11 = vor.u32 %v4621_v9, %v3758_v10  ;;  %s5071_s25 = smov 16   ;;  %s5072_s5 = smov 32  }
 0x16d   : > { %896 = vmatpush.bf16.msra.mxu0 %v3773_v50  ;;  %s5073_s20 = smov 40  }
 0x170   : > { %909 = vmatpush.bf16.msra.mxu1 %v3777_v0 }
 0x171   : > { %897 = vmatpush.bf16.msra.mxu0 %v3765_v53 }
 0x174   : > { %910 = vmatpush.bf16.msra.mxu1 %v3769_v4 }
 0x175   : > { %898 = vmatpush.bf16.msra.mxu0 %v3757_v56 }
 0x178   : > { %3786 = vmatmul.msk.bf16.vlgmr.msra.gmra.mxu0 %vm887_vm9, %v832_v58  ;;  %911 = vmatpush.bf16.msra.mxu1 %v3761_v11 }
 0x17b   : > { %3787 = vmatmul.msk.bf16.vlgmr.msra.gmra.mxu1 %vm887_vm9, %v832_v58 }
 0x1f5   : > { %v900_v6 = vpop.f32.mrf.mxu0 }
 0x1f6   : > { %v901_v7 = vadd.f32 %v900_v6, %v843_v5 }
 0x1f8   : > { %926 = vrot.lane.b32.xlu2 %v901_v7, %s5061_s3  ;;  %922 = vrot.lane.b32.xlu1 %v901_v7, %s5062_s1  ;;  %v913_v21 = vpop.f32.mrf.mxu1 }
 0x1f9   : > { %918 = vrot.lane.b32.xlu0 %v901_v7, %s5063_s2  ;;  %v5363_v22 = vadd.f32 %v913_v21, %v844_v20 }
 0x1fb   : > { %1277 = vmatpush.msrb.mxu1 %v5363_v22 }
 0x1fd   : > { %v902_v8 = vpop.f32.mrf.mxu0 }
 0x200   : > { %928 = vrot.lane.b32.xlu2 %v901_v7, %s5064_s7  ;;  %924 = vrot.lane.b32.xlu1 %v901_v7, %s5065_s29  ;;  %v915_v23 = vpop.f32.mrf.mxu1 }
 0x201   : > { %920 = vrot.lane.b32.xlu0 %v901_v7, %s5066_s0 }
 0x208   : > { %954 = vrot.lane.b32.xlu1 %v901_v7, %s5067_s30 }
 0x209   : > { %930 = vrot.lane.b32.xlu0 %v901_v7, %s5068_s17 }
 0x252   : > { %v927_v12 = vpop.permute.xlu2 %926 }
 0x25a   : > { %v929_v15 = vpop.permute.xlu2 %928 }
 0x26a   : > { %v923_v13 = vpop.permute.xlu1 %922 }
 0x26b   : > { %v919_v14 = vpop.permute.xlu0 %918  ;;  %1033 = vrot.lane.b32.xlu1 %v923_v13, %s5067_s30 }
 0x26c   : > { %981 = vrot.lane.b32.xlu2 %v919_v14, %s5067_s30 }
 0x272   : > { %v925_v16 = vpop.permute.xlu1 %924 }
 0x273   : > { %v921_v17 = vpop.permute.xlu0 %920  ;;  %1111 = vrot.lane.b32.xlu1 %v929_v15, %s5067_s30 }
 0x274   : > { %1059 = vrot.lane.b32.xlu2 %v925_v16, %s5067_s30  ;;  %1007 = vrot.lane.b32.xlu0 %v921_v17, %s5067_s30 }
 0x27a   : > { %v955_v18 = vpop.permute.xlu1 %954 }
 0x27b   : > { %v931_v19 = vpop.permute.xlu0 %930  ;;  %3788 = vmatpush.xpose.msk.msra.mxu2 %vm956_vm10, %v955_v18 }
 0x27c   : > { %1085 = vrot.lane.b32.xlu0 %v927_v12, %s5067_s30  ;;  %1137 = vrot.lane.b32.xlu2 %v931_v19, %s5067_s30  ;;  %s5906_s30 = scalar_lea.vmem %s5843_s9, %s5243_s22 }
 0x27e   : > { %3789 = vmatmul.msk.f32.vlgmr.msra.gmra.mxu2 %vm956_vm10, %v901_v7 }
 0x284   : > { %936 = vrot.lane.b32.xlu0 %v5363_v22, %s5066_s0 }
 0x2c6   : > { %v982_v24 = vpop.permute.xlu2 %981 }
 0x2c7   : > { %3790 = vmatpush.xpose.msk.msra.mxu3 %vm956_vm10, %v982_v24 }
 0x2ca   : > { %3791 = vmatmul.msk.f32.vlgmr.msra.gmra.mxu3 %vm956_vm10, %v919_v14 }
 0x2ce   : > { %v1060_v26 = vpop.permute.xlu2 %1059 }
 0x2d6   : > { %v1138_v30 = vpop.permute.xlu2 %1137 }
 0x2dd   : > { %v1034_v25 = vpop.permute.xlu1 %1033 }
 0x2de   : > { %3794 = vmatpush.xpose.msk.msrb.mxu3 %vm956_vm10, %v1034_v25 }
 0x2e1   : > { %3795 = vmatmul.msk.f32.vlgmr.msrb.gmra.mxu3 %vm956_vm10, %v923_v13 }
 0x2e5   : > { %v1112_v28 = vpop.permute.xlu1 %1111 }
 0x2e6   : > { %v1008_v27 = vpop.permute.xlu0 %1007 }
 0x2e7   : > { %3792 = vmatpush.xpose.msk.msrb.mxu2 %vm956_vm10, %v1008_v27 }
 0x2ea   : > { %3793 = vmatmul.msk.f32.vlgmr.msrb.gmra.mxu2 %vm956_vm10, %v921_v17 }
 0x2eb   : > { %3796 = vmatpush.xpose.msk.msra.mxu2 %vm956_vm10, %v1060_v26 }
 0x2ee   : > { %v1086_v29 = vpop.permute.xlu0 %1085 }
 0x2ef   : > { %3800 = vmatpush.xpose.msk.msrb.mxu2 %vm956_vm10, %v1112_v28  ;;  %3798 = vmatpush.xpose.msk.msra.mxu3 %vm956_vm10, %v1086_v29 }
 0x2f2   : > { %3797 = vmatmul.msk.f32.vlgmr.msra.gmra.mxu2 %vm956_vm10, %v925_v16  ;;  %3799 = vmatmul.msk.f32.vlgmr.msra.gmra.mxu3 %vm956_vm10, %v927_v12 }
 0x2f3   : > { %3802 = vmatpush.xpose.msk.msrb.mxu3 %vm956_vm10, %v1138_v30 }
 0x2f6   : > { %v937_v34 = vpop.permute.xlu0 %936 }
 0x2f7   : > { %1323 = vmatpush.msra.mxu2 %v937_v34 }
 0x2fa   : > { %3801 = vmatmul.msk.f32.vlgmr.msrb.gmra.mxu2 %vm956_vm10, %v929_v15  ;;  %3803 = vmatmul.msk.f32.vlgmr.msrb.gmra.mxu3 %vm956_vm10, %v931_v19 }
 0x301   : > { %v978_v31 = vpop.f32.mrf.mxu2 }
 0x302   : > { %v1163_v32 = vmul.f32 0.35355338, %v978_v31 }
 0x304   : > { %v1171_v33 = vsel %vm956_vm10, %v1163_v32, -inf }
 0x305   : > { %1172 = vmax.xlane.f32.xlu0 %v1171_v33 }
 0x34d   : > { %v1004_v35 = vpop.f32.mrf.mxu3 }
 0x34e   : > { %v1164_v36 = vmul.f32 0.35355338, %v1004_v35 }
 0x350   : > { %v1174_v37 = vsel %vm956_vm10, %v1164_v36, -inf }
 0x351   : > { %1175 = vmax.xlane.f32.xlu2 %v1174_v37 }
 0x364   : > { %v1056_v38 = vpop.f32.mrf.mxu3 }
 0x365   : > { %v1166_v39 = vmul.f32 0.35355338, %v1056_v38 }
 0x367   : > { %v1180_v40 = vsel %vm956_vm10, %v1166_v39, -inf }
 0x368   : > { %1181 = vmax.xlane.f32.xlu2 %v1180_v40 }
 0x36d   : > { %v1030_v41 = vpop.f32.mrf.mxu2 }
 0x36e   : > { %v1165_v42 = vmul.f32 0.35355338, %v1030_v41 }
 0x370   : > { %v1177_v43 = vsel %vm956_vm10, %v1165_v42, -inf }
 0x371   : > { %1178 = vmax.xlane.f32.xlu1 %v1177_v43 }
 0x375   : > { %v1082_v44 = vpop.f32.mrf.mxu2  ;;  %v1108_v49 = vpop.f32.mrf.mxu3 }
 0x376   : > { %v1167_v45 = vmul.f32 0.35355338, %v1082_v44  ;;  %v1168_v55 = vmul.f32 0.35355338, %v1108_v49 }
 0x378   : > { %v1183_v46 = vsel %vm956_vm10, %v1167_v45, -inf  ;;  %v1173_v47 = vpop.xlane.xlu0 %1172  ;;  %v1186_v60 = vsel %vm956_vm10, %v1168_v55, -inf }
 0x379   : > { %1184 = vmax.xlane.f32.xlu2 %v1183_v46  ;;  %v1195_v48 = vsub.f32 %v1163_v32, %v1173_v47 }
 0x37b   : > { %v1203_v50 = vmul.f32 1.442695, %v1195_v48 }
 0x37d   : > { %4926 = vpow2.f32 %v1203_v50  ;;  %v1134_v51 = vpop.f32.mrf.mxu2  ;;  %v1160_v58 = vpop.f32.mrf.mxu3 }
 0x37e   : > { %v1169_v52 = vmul.f32 0.35355338, %v1134_v51  ;;  %v1170_v59 = vmul.f32 0.35355338, %v1160_v58 }
 0x380   : > { %v1189_v53 = vsel %vm956_vm10, %v1169_v52, -inf  ;;  %v1192_v61 = vsel %vm956_vm10, %v1170_v59, -inf }
 0x381   : > { %1190 = vmax.xlane.f32.xlu0 %v1189_v53 }
 0x383   : > { %v4927_v54 = vpop.eup %4926 }
 0x384   : > { %v1219_v56 = vsel %vm956_vm10, %v4927_v54, 0.0 }
 0x385   : > { %1220 = vadd.xlane.f32.xlu1 %v1219_v56 }
 0x389   : > { %1187 = vmax.xlane.f32.xlu0 %v1186_v60 }
 0x38d   : > { %1193 = vmax.xlane.f32.xlu1 %v1192_v61 }
 0x391   : > { %939 = vrot.lane.b32.xlu2 %v5363_v22, %s5062_s1  ;;  %s5075_s1 = smov 48  }
 0x39d   : > { %933 = vrot.lane.b32.xlu0 %v5363_v22, %s5063_s2 }
 0x3c4   : > { %v1176_v62 = vpop.xlane.xlu2 %1175 }
 0x3c5   : > { %v1196_v63 = vsub.f32 %v1164_v36, %v1176_v62 }
 0x3c7   : > { %v1205_v0 = vmul.f32 1.442695, %v1196_v63 }
 0x3c9   : > { %4928 = vpow2.f32 %v1205_v0 }
 0x3cf   : > { %v4929_v1 = vpop.eup %4928 }
 0x3d0   : > { %v1222_v2 = vsel %vm956_vm10, %v4929_v1, 0.0 }
 0x3d1   : > { %1223 = vadd.xlane.f32.xlu1 %v1222_v2 }
 0x3db   : > { %v1182_v3 = vpop.xlane.xlu2 %1181 }
 0x3dc   : > { %v1198_v4 = vsub.f32 %v1166_v39, %v1182_v3 }
 0x3de   : > { %v1209_v5 = vmul.f32 1.442695, %v1198_v4 }
 0x3e0   : > { %4930 = vpow2.f32 %v1209_v5 }
 0x3e4   : > { %v1179_v6 = vpop.xlane.xlu1 %1178 }
 0x3e5   : > { %v1197_v7 = vsub.f32 %v1165_v42, %v1179_v6 }
 0x3e6   : > { %v4931_v8 = vpop.eup %4930 }
 0x3e7   : > { %v1207_v9 = vmul.f32 1.442695, %v1197_v7  ;;  %v1228_v10 = vsel %vm956_vm10, %v4931_v8, 0.0 }
 0x3e8   : > { %1229 = vadd.xlane.f32.xlu0 %v1228_v10  ;;  %v4630_v10 = vld [vmem:[%s5269_s26 + $0x8] sm:$0xff] }
 0x3e9   : > { %4932 = vpow2.f32 %v1207_v9  ;;  %v4631_v9 = vld [vmem:[%s5269_s26 + $0x10] sm:$0xff] }
 0x3ec   : > { %v1185_v11 = vpop.xlane.xlu2 %1184 }
 0x3ed   : > { %v1199_v12 = vsub.f32 %v1167_v45, %v1185_v11  ;;  %v4629_v11 = vld [vmem:[%s5269_s26] sm:$0xff] }
 0x3ef   : > { %v4933_v13 = vpop.eup %4932  ;;  %v1211_v14 = vmul.f32 1.442695, %v1199_v12 }
 0x3f0   : > { %v1225_v15 = vsel %vm956_vm10, %v4933_v13, 0.0 }
 0x3f1   : > { %4934 = vpow2.f32 %v1211_v14  ;;  %1226 = vadd.xlane.f32.xlu2 %v1225_v15 }
 0x3f4   : > { %v940_v16 = vpop.permute.xlu2 %939  ;;  %v1191_v17 = vpop.xlane.xlu0 %1190 }
 0x3f5   : > { %v1201_v18 = vsub.f32 %v1169_v52, %v1191_v17  ;;  %1346 = vmatpush.msra.mxu3 %v940_v16 }
 0x3f7   : > { %v4935_v19 = vpop.eup %4934  ;;  %v1215_v20 = vmul.f32 1.442695, %v1201_v18 }
 0x3f8   : > { %v1231_v21 = vsel %vm956_vm10, %v4935_v19, 0.0  ;;  %v1221_v23 = vpop.xlane.xlu1 %1220 }
 0x3f9   : > { %4936 = vpow2.f32 %v1215_v20  ;;  %1232 = vadd.xlane.f32.xlu1 %v1231_v21 }
 0x3fa   : > { %4938 = vrcp.f32 %v1221_v23 }
 0x3fc   : > { %v1188_v24 = vpop.xlane.xlu0 %1187  ;;  %951 = vrot.lane.b32.xlu0 %v5363_v22, %s5068_s17 }
 0x3fd   : > { %v1200_v25 = vsub.f32 %v1168_v55, %v1188_v24 }
 0x3ff   : > { %v4937_v26 = vpop.eup %4936  ;;  %v1213_v27 = vmul.f32 1.442695, %v1200_v25 }
 0x400   : > { %v4939_v28 = vpop.eup %4938  ;;  %v1194_v29 = vpop.xlane.xlu1 %1193  ;;  %v1237_v30 = vsel %vm956_vm10, %v4937_v26, 0.0 }
 0x401   : > { %4940 = vpow2.f32 %v1213_v27  ;;  %v1202_v31 = vsub.f32 %v1170_v59, %v1194_v29  ;;  %1238 = vadd.xlane.f32.xlu2 %v1237_v30  ;;  %v1251_v32 = vmul.f32 %v4939_v28, %v4927_v54 }
 0x403   : > { %v1217_v33 = vmul.f32 1.442695, %v1202_v31  ;;  %3804 = vmatmul.msk.f32.vlgmr.msrb.gmra.mxu1 %vm956_vm10, %v1251_v32 }
 0x404   : > { %945 = vrot.lane.b32.xlu0 %v5363_v22, %s5061_s3  ;;  %s5074_s3 = smov 56  }
 0x405   : > { %4942 = vpow2.f32 %v1217_v33 }
 0x407   : > { %v4941_v34 = vpop.eup %4940 }
 0x408   : > { %v1234_v35 = vsel %vm956_vm10, %v4941_v34, 0.0 }
 0x409   : > { %1235 = vadd.xlane.f32.xlu1 %v1234_v35 }
 0x40b   : > { %v4943_v36 = vpop.eup %4942 }
 0x40c   : > { %v1240_v38 = vsel %vm956_vm10, %v4943_v36, 0.0 }
 0x40f   : > { %v934_v37 = vpop.permute.xlu0 %933 }
 0x410   : > { %1300 = vmatpush.msra.mxu1 %v934_v37 }
 0x411   : > { %1241 = vadd.xlane.f32.xlu1 %v1240_v38 }
 0x419   : > { %942 = vrot.lane.b32.xlu2 %v5363_v22, %s5065_s29 }
 0x42a   : > { %948 = vrot.lane.b32.xlu1 %v5363_v22, %s5064_s7  ;;  %s5905_s7 = scalar_lea.vmem %s5842_s8, %s5243_s22 }
 0x42b   : > { %v4919_v28 = vld [vmem:[%s5905_s7] ss:$0 sm:$0xff]  ;;  %s5910_s7 = sld [smem:[#allocation29_spill]] }
 0x444   : > { %v1224_v39 = vpop.xlane.xlu1 %1223 }
 0x445   : > { %4944 = vrcp.f32 %v1224_v39 }
 0x44b   : > { %v4945_v40 = vpop.eup %4944 }
 0x44c   : > { %v1252_v41 = vmul.f32 %v4945_v40, %v4929_v1 }
 0x44e   : > { %3805 = vmatmul.msk.f32.vlgmr.msra.gmra.mxu1 %vm956_vm10, %v1252_v41 }
 0x45b   : > { %v1230_v42 = vpop.xlane.xlu0 %1229 }
 0x45c   : > { %4946 = vrcp.f32 %v1230_v42 }
 0x462   : > { %v4947_v43 = vpop.eup %4946 }
 0x463   : > { %v1254_v44 = vmul.f32 %v4947_v43, %v4931_v8  ;;  %v4632_v8 = vld [vmem:[%s5269_s26 + $0x18] sm:$0xff] }
 0x464   : > { %v1227_v45 = vpop.xlane.xlu2 %1226 }
 0x465   : > { %4948 = vrcp.f32 %v1227_v45  ;;  %3807 = vmatmul.msk.f32.vlgmr.msra.gmra.mxu3 %vm956_vm10, %v1254_v44  ;;  %v4023_v45 = vld [vmem:[%s5288_s18 + $0x180] sm:$0xf] }
 0x46b   : > { %v4949_v46 = vpop.eup %4948 }
 0x46c   : > { %v1253_v47 = vmul.f32 %v4949_v46, %v4933_v13  ;;  %v1233_v22 = vpop.xlane.xlu1 %1232  ;;  %v4689_v46 = vld [vmem:[%s5288_s18 + $0x1bc] sm:$0xf0] }
 0x46d   : > { %4950 = vrcp.f32 %v1233_v22  ;;  %v4025_v22 = vld [vmem:[%s5288_s18 + $0x1c0] sm:$0xf0] }
 0x46e   : > { %3806 = vmatmul.msk.f32.vlgmr.msra.gmra.mxu2 %vm956_vm10, %v1253_v47  ;;  %v952_v48 = vpop.permute.xlu0 %951  ;;  %v4681_v47 = vld [vmem:[%s5288_s18 + $0x184] sm:$0xf] }
 0x46f   : > { %1438 = vmatpush.msrb.mxu3 %v952_v48  ;;  %v4024_v48 = vor.u32 %v4689_v46, %v4023_v45  ;;  %v4675_v46 = vld [vmem:[%s5288_s18 + $0x14c] sm:$0xf0] }
 0x473   : > { %v4951_v51 = vpop.eup %4950 }
 0x474   : > { %v1239_v49 = vpop.xlane.xlu2 %1238  ;;  %v1255_v54 = vmul.f32 %v4951_v51, %v4935_v19  ;;  %v4028_v51 = vor.u32 %v4681_v47, %v4025_v22  ;;  %v4667_v47 = vld [vmem:[%s5288_s18 + $0x114] sm:$0xf] }
 0x476   : > { %v946_v50 = vpop.permute.xlu0 %945 }
 0x477   : > { %1392 = vmatpush.msrb.mxu1 %v946_v50  ;;  %v4690_v50 = vld [vmem:[%s5288_s18 + $0x1c4] sm:$0xf0] }
 0x479   : > { %2005 = vmatpush.bf16.msra.mxu1 %v4024_v48  ;;  %v3977_v48 = vld [vmem:[%s5288_s18 + $0x150] sm:$0xf0] }
 0x47c   : > { %v943_v52 = vpop.permute.xlu2 %942  ;;  %v1236_v53 = vpop.xlane.xlu1 %1235 }
 0x47d   : > { %4952 = vrcp.f32 %v1236_v53  ;;  %1369 = vmatpush.msrb.mxu0 %v943_v52  ;;  %v4682_v53 = vld [vmem:[%s5288_s18 + $0x18c] sm:$0xf] }
 0x47e   : > { %3808 = vmatmul.msk.f32.vlgmr.msrb.gmra.mxu0 %vm956_vm10, %v1255_v54  ;;  %v4033_v54 = vld [vmem:[%s5288_s18 + $0x1c8] sm:$0xf0] }
 0x47f   : > { %1528 = vmatpush.bf16.msra.mxu0 %v4632_v8 }
 0x480   : > { %v1279_v0 = vpop.f32.mrf.mxu1 }
 0x483   : > { %v4953_v55 = vpop.eup %4952  ;;  %1529 = vmatpush.bf16.msra.mxu0 %v4631_v9  ;;  %v3897_v9 = vld [vmem:[%s5288_s18 + $0xc0] sm:$0xf0] }
 0x484   : > { %v1256_v56 = vmul.f32 %v4953_v55, %v4941_v34  ;;  %v1242_v58 = vpop.xlane.xlu1 %1241  ;;  %v5076_v34 = vmov 64.0   ;;  %v4036_v55 = vor.u32 %v4682_v53, %v4033_v54 }
 0x485   : > { %4954 = vrcp.f32 %v1242_v58  ;;  %v4673_v58 = vld [vmem:[%s5288_s18 + $0x13c] sm:$0xf0] }
 0x486   : > { %3809 = vmatmul.msk.f32.vlgmr.msrb.gmra.mxu1 %vm956_vm10, %v1256_v56  ;;  %4956 = vrcp.f32 %v1239_v49  ;;  %v4031_v49 = vld [vmem:[%s5288_s18 + $0x188] sm:$0xf]  ;;  %v3959_v56 = vld [vmem:[%s5288_s18 + $0x100] sm:$0xf] }
 0x487   : > { %1530 = vmatpush.bf16.msra.mxu0 %v4630_v10  ;;  %4958 = vrcp.f32 %v5076_v34  ;;  %v4032_v52 = vor.u32 %v4690_v50, %v4031_v49  ;;  %v3903_v10 = vld [vmem:[%s5288_s18 + $0x88] sm:$0xf]  ;;  %v4041_v34 = vld [vmem:[%s5288_s18 + $0x1d0] sm:$0xf0]  ;;  %v3980_v49 = vor.u32 %v4667_v47, %v3977_v48  ;;  %v3983_v50 = vld [vmem:[%s5288_s18 + $0x118] sm:$0xf] }
 0x488   : > { %v3993_v47 = vld [vmem:[%s5288_s18 + $0x160] sm:$0xf0]  ;;  %v3999_v48 = vld [vmem:[%s5288_s18 + $0x128] sm:$0xf] }
 0x489   : > { %2031 = vmatpush.bf16.msra.mxu3 %v4032_v52  ;;  %v4668_v52 = vld [vmem:[%s5288_s18 + $0x11c] sm:$0xf] }
 0x48b   : > { %v4955_v59 = vpop.eup %4954  ;;  %1531 = vmatpush.bf16.msra.mxu0 %v4629_v11  ;;  %v4658_v11 = vld [vmem:[%s5288_s18 + $0xc4] sm:$0xf0] }
 0x48c   : > { %v1258_v60 = vmul.f32 %v4955_v59, %v4943_v36  ;;  %v4957_v61 = vpop.eup %4956  ;;  %v4665_v59 = vld [vmem:[%s5288_s18 + $0x104] sm:$0xf] }
 0x48d   : > { %v1257_v62 = vmul.f32 %v4957_v61, %v4937_v26  ;;  %v4959_v35 = vpop.eup %4958  ;;  %v3961_v61 = vld [vmem:[%s5288_s18 + $0x140] sm:$0xf0] }
 0x48e   : > { %3811 = vmatmul.msk.f32.vlgmr.msrb.gmra.mxu3 %vm956_vm10, %v1258_v60  ;;  %v1544_v36 = vmul.f32 64.0, %v4959_v35  ;;  %vm1548_vm1 = vweird.f32 %v4959_v35  ;;  %v3960_v60 = vor.u32 %v4673_v58, %v3959_v56  ;;  %v3911_v56 = vld [vmem:[%s5288_s18 + $0x90] sm:$0xf] }
 0x48f   : > { %2044 = vmatpush.bf16.msrb.mxu0 %v4036_v55  ;;  %v3985_v55 = vld [vmem:[%s5288_s18 + $0x158] sm:$0xf0] }
 0x490   : > { %v1545_v37 = vsub.f32 1.0, %v1544_v36  ;;  %2006 = vmatpush.bf16.msra.mxu1 %v3960_v60  ;;  %v4692_v36 = vld [vmem:[%s5288_s18 + $0x1d4] sm:$0xf0]  ;;  %v3988_v58 = vor.u32 %v4668_v52, %v3985_v55  ;;  %v4651_v60 = vld [vmem:[%s5288_s18 + $0x94] sm:$0xf] }
 0x492   : > { %v1546_v38 = vmul.f32 %v4959_v35, %v1545_v37 }
 0x494   : > { %v1547_v39 = vadd.f32 %v4959_v35, %v1546_v38 }
 0x496   : > { %v5431_v40 = vsel %vm1548_vm1, %v4959_v35, %v1547_v39  ;;  %v4047_v35 = vld [vmem:[%s5288_s18 + $0x198] sm:$0xf] }
 0x497   : > { %v4048_v39 = vor.u32 %v4692_v36, %v4047_v35  ;;  %v4694_v36 = vld [vmem:[%s5288_s18 + $0x1e4] sm:$0xf0] }
 0x49c   : > { %v949_v63 = vpop.permute.xlu1 %948 }
 0x49d   : > { %1415 = vmatpush.msrb.mxu2 %v949_v63  ;;  %v4674_v63 = vld [vmem:[%s5288_s18 + $0x144] sm:$0xf0] }
 0x49e   : > { %3810 = vmatmul.msk.f32.vlgmr.msrb.gmra.mxu2 %vm956_vm10, %v1257_v62  ;;  %v3967_v62 = vld [vmem:[%s5288_s18 + $0x108] sm:$0xf] }
 0x49f   : > { %2018 = vmatpush.bf16.msra.mxu2 %v4028_v51  ;;  %v4676_v51 = vld [vmem:[%s5288_s18 + $0x154] sm:$0xf0] }
 0x4a0   : > { %v3984_v54 = vor.u32 %v4676_v51, %v3983_v50  ;;  %v4001_v50 = vld [vmem:[%s5288_s18 + $0x168] sm:$0xf0] }
 0x4cb   : > { %v1302_v1 = vpop.f32.mrf.mxu1 }
 0x4cc   : > { %1444 = vrot.lane.b32.xlu2 %v1302_v1, %s5069_s4  ;;  %v3968_v1 = vor.u32 %v4674_v63, %v3967_v62  ;;  %v3919_v63 = vld [vmem:[%s5288_s18 + $0x98] sm:$0xf] }
 0x4ce   : > { %2032 = vmatpush.bf16.msra.mxu3 %v3968_v1  ;;  %v4652_v1 = vld [vmem:[%s5288_s18 + $0x9c] sm:$0xf] }
 0x4e8   : > { %v1348_v2 = vpop.f32.mrf.mxu3 }
 0x4e9   : > { %1452 = vrot.lane.b32.xlu2 %v1348_v2, %s5070_s23  ;;  %v4666_v2 = vld [vmem:[%s5288_s18 + $0x10c] sm:$0xf]  ;;  %s5907_s23 = scalar_lea.vmem %s5844_s10, %s5243_s22 }
 0x4f1   : > { %v1325_v3 = vpop.f32.mrf.mxu2 }
 0x4f2   : > { %1448 = vrot.lane.b32.xlu0 %v1325_v3, %s5071_s25  ;;  %v3969_v3 = vld [vmem:[%s5288_s18 + $0x148] sm:$0xf0] }
 0x4fb   : > { %v1371_v4 = vpop.f32.mrf.mxu0 }
 0x4fc   : > { %1456 = vrot.lane.b32.xlu1 %v1371_v4, %s5072_s5  ;;  %v3972_v4 = vor.u32 %v4666_v2, %v3969_v3 }
 0x4fe   : > { %2045 = vmatpush.bf16.msrb.mxu0 %v3972_v4  ;;  %v3921_v4 = vld [vmem:[%s5288_s18 + $0xd8] sm:$0xf0] }
 0x503   : > { %v1394_v5 = vpop.f32.mrf.mxu1 }
 0x504   : > { %1460 = vrot.lane.b32.xlu0 %v1394_v5, %s5073_s20  ;;  %v3895_v5 = vld [vmem:[%s5288_s18 + $0x80] sm:$0xf]  ;;  %s5909_s20 = sld [smem:[#allocation7_spill]] }
 0x511   : > { %v1440_v6 = vpop.f32.mrf.mxu3 }
 0x512   : > { %1468 = vrot.lane.b32.xlu1 %v1440_v6, %s5074_s3  ;;  %v4657_v6 = vld [vmem:[%s5288_s18 + $0xbc] sm:$0xf0] }
 0x513   : > { %v3896_v8 = vor.u32 %v4657_v6, %v3895_v5  ;;  %v3847_v5 = vld [vmem:[%s5288_s18 + $0x10] sm:$0xf] }
 0x514   : > { %v4643_v6 = vld [vmem:[%s5288_s18 + $0x4c] sm:$0xf0] }
 0x515   : > { %2007 = vmatpush.bf16.msra.mxu1 %v3896_v8  ;;  %v4635_v8 = vld [vmem:[%s5288_s18 + $0x14] sm:$0xf] }
 0x521   : > { %v1417_v7 = vpop.f32.mrf.mxu2 }
 0x522   : > { %1464 = vrot.lane.b32.xlu2 %v1417_v7, %s5075_s1  ;;  %v4649_v7 = vld [vmem:[%s5288_s18 + $0x84] sm:$0xf] }
 0x526   : > { %v1445_v12 = vpop.permute.xlu2 %1444 }
 0x527   : > { %v1471_v16 = vsel %vm956_vm10, %v1279_v0, %v1445_v12  ;;  %v3964_v0 = vor.u32 %v4665_v59, %v3961_v61  ;;  %v3900_v12 = vor.u32 %v4649_v7, %v3897_v9  ;;  %v4659_v59 = vld [vmem:[%s5288_s18 + $0xcc] sm:$0xf0]  ;;  %v3913_v61 = vld [vmem:[%s5288_s18 + $0xd0] sm:$0xf0]  ;;  %v3924_v7 = vor.u32 %v4652_v1, %v3921_v4 }
 0x528   : > { %v3912_v62 = vor.u32 %v4659_v59, %v3911_v56  ;;  %v3916_v2 = vor.u32 %v4651_v60, %v3913_v61  ;;  %v3849_v9 = vld [vmem:[%s5288_s18 + $0x50] sm:$0xf0]  ;;  %v3929_v59 = vld [vmem:[%s5288_s18 + $0xe0] sm:$0xf0]  ;;  %v3935_v60 = vld [vmem:[%s5288_s18 + $0xa8] sm:$0xf] }
 0x529   : > { %2019 = vmatpush.bf16.msra.mxu2 %v3964_v0  ;;  %v4660_v0 = vld [vmem:[%s5288_s18 + $0xd4] sm:$0xf0]  ;;  %v4662_v61 = vld [vmem:[%s5288_s18 + $0xe4] sm:$0xf0] }
 0x52a   : > { %v3920_v3 = vor.u32 %v4660_v0, %v3919_v63  ;;  %v3937_v63 = vld [vmem:[%s5288_s18 + $0xe8] sm:$0xf0]  ;;  %v3936_v4 = vor.u32 %v4662_v61, %v3935_v60  ;;  %v4648_v60 = vld [vmem:[%s5288_s18 + $0x74] sm:$0xf0]  ;;  %v4640_v61 = vld [vmem:[%s5288_s18 + $0x3c] sm:$0xf] }
 0x52d   : > { %2020 = vmatpush.bf16.msra.mxu2 %v3900_v12  ;;  %v4636_v12 = vld [vmem:[%s5288_s18 + $0x1c] sm:$0xf] }
 0x543   : > { %v1453_v14 = vpop.permute.xlu2 %1452 }
 0x564   : > { %v1449_v13 = vpop.permute.xlu0 %1448 }
 0x565   : > { %v1473_v17 = vsel %vm1472_vm11, %v1471_v16, %v1449_v13  ;;  %v3904_v13 = vor.u32 %v4658_v11, %v3903_v10  ;;  %v3855_v10 = vld [vmem:[%s5288_s18 + $0x18] sm:$0xf] }
 0x566   : > { %v1475_v19 = vsel %vm1474_vm12, %v1473_v17, %v1453_v14  ;;  %v4650_v14 = vld [vmem:[%s5288_s18 + $0x8c] sm:$0xf]  ;;  %v3831_v17 = vld [vmem:[%s5288_s18] sm:$0xf]  ;;  %v4644_v11 = vld [vmem:[%s5288_s18 + $0x54] sm:$0xf0] }
 0x567   : > { %2033 = vmatpush.bf16.msra.mxu3 %v3904_v13  ;;  %v3857_v13 = vld [vmem:[%s5288_s18 + $0x58] sm:$0xf0] }
 0x56e   : > { %v1457_v15 = vpop.permute.xlu1 %1456 }
 0x56f   : > { %v1477_v21 = vsel %vm1476_vm13, %v1475_v19, %v1457_v15  ;;  %v3905_v15 = vld [vmem:[%s5288_s18 + $0xc8] sm:$0xf0]  ;;  %v4633_v19 = vld [vmem:[%s5288_s18 + $0x4] sm:$0xf] }
 0x570   : > { %v3908_v16 = vor.u32 %v4650_v14, %v3905_v15  ;;  %v3848_v14 = vor.u32 %v4643_v6, %v3847_v5  ;;  %v3852_v15 = vor.u32 %v4635_v8, %v3849_v9  ;;  %v4637_v6 = vld [vmem:[%s5288_s18 + $0x24] sm:$0xf]  ;;  %v3871_v8 = vld [vmem:[%s5288_s18 + $0x28] sm:$0xf] }
 0x571   : > { %v4646_v9 = vld [vmem:[%s5288_s18 + $0x64] sm:$0xf0] }
 0x572   : > { %2046 = vmatpush.bf16.msrb.mxu0 %v3908_v16  ;;  %v3856_v16 = vor.u32 %v4644_v11, %v3855_v10  ;;  %v4638_v10 = vld [vmem:[%s5288_s18 + $0x2c] sm:$0xf] }
 0x573   : > { %v3873_v11 = vld [vmem:[%s5288_s18 + $0x68] sm:$0xf0] }
 0x576   : > { %v1461_v18 = vpop.permute.xlu0 %1460 }
 0x577   : > { %v1479_v23 = vsel %vm1478_vm14, %v1477_v21, %v1461_v18  ;;  %v4641_v18 = vld [vmem:[%s5288_s18 + $0x3c] sm:$0xf0]  ;;  %v3833_v21 = vld [vmem:[%s5288_s18 + $0x40] sm:$0xf0] }
 0x57c   : > { %v1465_v20 = vpop.permute.xlu2 %1464 }
 0x57d   : > { %v1481_v24 = vsel %vm1480_vm15, %v1479_v23, %v1465_v20  ;;  %v3832_v20 = vor.u32 %v4641_v18, %v3831_v17  ;;  %v3839_v23 = vld [vmem:[%s5288_s18 + $0x8] sm:$0xf]  ;;  %v3860_v18 = vor.u32 %v4636_v12, %v3857_v13 }
 0x57f   : > { %2008 = vmatpush.bf16.msra.mxu1 %v3832_v20 }
 0x584   : > { %v1469_v25 = vpop.permute.xlu1 %1468 }
 0x585   : > { %v1483_v26 = vsel %vm1482_vm0, %v1481_v24, %v1469_v25  ;;  %v4642_v24 = vld [vmem:[%s5288_s18 + $0x44] sm:$0xf0]  ;;  %v3836_v25 = vor.u32 %v4633_v19, %v3833_v21 }
 0x586   : > { %v1484_v27 = vpack.c.bf16 %v1483_v26, %v1483_v26  ;;  %v3840_v26 = vor.u32 %v4642_v24, %v3839_v23 }
 0x587   : > { %2021 = vmatpush.bf16.msra.mxu2 %v3836_v25  ;;  %v4920_v25 = vld [vmem:[%s5906_s30] ss:$0 sm:$0xff]  ;;  %s3528_s30 = sshll.u32 %s5313_s27, 4  ;;  %s3529_s30 = int_to_ptr.vmem [resolvable:$true] %s3528_s30 }
 0x588   : > { %3828 = vmatmul.msk.bf16.vlgmr.msra.gmra.mxu0 %vm887_vm9, %v1484_v27  ;;  %v4634_v27 = vld [vmem:[%s5288_s18 + $0xc] sm:$0xf]  ;;  %2034 = vmatpush.bf16.msra.mxu3 %v3840_v26 }
 0x58c   : > { %2083 = vmatpush.bf16.msrb.mxu3 %v4048_v39 }
 0x590   : > { %2084 = vmatpush.bf16.msrb.mxu3 %v3984_v54  ;;  %v4661_v54 = vld [vmem:[%s5288_s18 + $0xdc] sm:$0xf0] }
 0x594   : > { %2085 = vmatpush.bf16.msrb.mxu3 %v3920_v3  ;;  %v4645_v3 = vld [vmem:[%s5288_s18 + $0x5c] sm:$0xf0] }
 0x598   : > { %2086 = vmatpush.bf16.msrb.mxu3 %v3856_v16  ;;  %v3872_v16 = vor.u32 %v4646_v9, %v3871_v8  ;;  %v4727_v8 = vld [vmem:[%s5303_s28 + $0xf0] sm:$0xff] }
 0x599   : > { %v4711_v9 = vld [vmem:[%s5303_s28 + $0x70] sm:$0xff] }
 0x605   : > { %v1533_v29 = vpop.f32.mrf.mxu0 }
 0x606   : > { %v1534_v30 = vadd.f32 %v4919_v28, %v1533_v29  ;;  %v3841_v28 = vld [vmem:[%s5288_s18 + $0x48] sm:$0xf0] }
 0x607   : > { %v3844_v29 = vor.u32 %v4634_v27, %v3841_v28  ;;  %v4921_v27 = vld [vmem:[%s5907_s23] ss:$0 sm:$0xff] }
 0x608   : > { %v1537_v31 = vadd.f32 %v1534_v30, %v5339_v57  ;;  %v4039_v30 = vld [vmem:[%s5288_s18 + $0x190] sm:$0xf] }
 0x609   : > { %2047 = vmatpush.bf16.msrb.mxu0 %v3844_v29 }
 0x60a   : > { %v1540_v32 = vsel %vm887_vm9, %v1537_v31, 0.0 }
 0x60b   : > { %1541 = vadd.xlane.f32.xlu0 %v1540_v32  ;;  %v4683_v32 = vld [vmem:[%s5288_s18 + $0x194] sm:$0xf] }
 0x60c   : > { %v4044_v38 = vor.u32 %v4683_v32, %v4041_v34  ;;  %v4685_v32 = vld [vmem:[%s5288_s18 + $0x1a4] sm:$0xf]  ;;  %v4063_v34 = vld [vmem:[%s5288_s18 + $0x1a8] sm:$0xf] }
 0x60d   : > { %v1535_v33 = vpop.f32.mrf.mxu0 }
 0x60e   : > { %2070 = vmatpush.bf16.msrb.mxu2 %v4044_v38  ;;  %v4065_v38 = vld [vmem:[%s5288_s18 + $0x1e8] sm:$0xf0] }
 0x612   : > { %2071 = vmatpush.bf16.msrb.mxu2 %v3980_v49  ;;  %v4670_v49 = vld [vmem:[%s5288_s18 + $0x12c] sm:$0xf] }
 0x613   : > { %v4004_v56 = vor.u32 %v4670_v49, %v4001_v50  ;;  %v3953_v49 = vld [vmem:[%s5288_s18 + $0xf8] sm:$0xf0] }
 0x616   : > { %2072 = vmatpush.bf16.msrb.mxu2 %v3916_v2  ;;  %v3863_v2 = vld [vmem:[%s5288_s18 + $0x20] sm:$0xf] }
 0x617   : > { %v3864_v12 = vor.u32 %v4645_v3, %v3863_v2  ;;  %v4704_v3 = vld [vmem:[%s5303_s28 + $0x38] sm:$0xff] }
 0x61a   : > { %2073 = vmatpush.bf16.msrb.mxu2 %v3852_v15  ;;  %v4695_v15 = vld [vmem:[%s5288_s18 + $0x1ec] sm:$0xf0] }
 0x67e   : > { %v1542_v57 = vpop.xlane.xlu0 %1541 }
 0x67f   : > { %v1550_v41 = vmul.f32 %v5431_v40, %v1542_v57  ;;  %v4684_v57 = vld [vmem:[%s5288_s18 + $0x19c] sm:$0xf] }
 0x681   : > { %v5434_v42 = vsub.f32 %v1537_v31, %v1550_v41  ;;  %v4691_v31 = vld [vmem:[%s5288_s18 + $0x1cc] sm:$0xf0]  ;;  %v4049_v41 = vld [vmem:[%s5288_s18 + $0x1d8] sm:$0xf0] }
 0x682   : > { %v4040_v33 = vor.u32 %v4691_v31, %v4039_v30  ;;  %v4052_v45 = vor.u32 %v4684_v57, %v4049_v41  ;;  %v4055_v30 = vld [vmem:[%s5288_s18 + $0x1a0] sm:$0xf] }
 0x683   : > { %v1552_v43 = vmul.f32 %v5434_v42, %v5434_v42  ;;  %v4693_v31 = vld [vmem:[%s5288_s18 + $0x1dc] sm:$0xf0] }
 0x684   : > { %2057 = vmatpush.bf16.msrb.mxu1 %v4040_v33  ;;  %2096 = vmatpush.bf16.msra.mxu0 %v4052_v45  ;;  %v4057_v33 = vld [vmem:[%s5288_s18 + $0x1e0] sm:$0xf0]  ;;  %v4056_v39 = vor.u32 %v4693_v31, %v4055_v30  ;;  %v3991_v41 = vld [vmem:[%s5288_s18 + $0x120] sm:$0xf]  ;;  %v4671_v31 = vld [vmem:[%s5288_s18 + $0x134] sm:$0xf] }
 0x685   : > { %v1553_v44 = vsel %vm887_vm9, %v1552_v43, 0.0  ;;  %v3975_v43 = vld [vmem:[%s5288_s18 + $0x110] sm:$0xf]  ;;  %v4060_v57 = vor.u32 %v4685_v32, %v4057_v33  ;;  %v4009_v32 = vld [vmem:[%s5288_s18 + $0x170] sm:$0xf0] }
 0x686   : > { %1554 = vadd.xlane.f32.xlu2 %v1553_v44  ;;  %v3976_v22 = vor.u32 %v4675_v46, %v3975_v43  ;;  %v4677_v43 = vld [vmem:[%s5288_s18 + $0x15c] sm:$0xf0]  ;;  %v4669_v46 = vld [vmem:[%s5288_s18 + $0x124] sm:$0xf]  ;;  %v4015_v33 = vld [vmem:[%s5288_s18 + $0x138] sm:$0xf] }
 0x687   : > { %v3992_v51 = vor.u32 %v4677_v43, %v3991_v41  ;;  %v3996_v52 = vor.u32 %v4669_v46, %v3993_v47  ;;  %v4663_v41 = vld [vmem:[%s5288_s18 + $0xec] sm:$0xf0]  ;;  %v3945_v46 = vld [vmem:[%s5288_s18 + $0xf0] sm:$0xf0]  ;;  %v3951_v47 = vld [vmem:[%s5288_s18 + $0xb8] sm:$0xf] }
 0x688   : > { %2058 = vmatpush.bf16.msrb.mxu1 %v3976_v22  ;;  %2097 = vmatpush.bf16.msra.mxu0 %v3988_v58  ;;  %v4678_v22 = vld [vmem:[%s5288_s18 + $0x164] sm:$0xf0]  ;;  %v4653_v58 = vld [vmem:[%s5288_s18 + $0xa4] sm:$0xf] }
 0x689   : > { %v4000_v55 = vor.u32 %v4678_v22, %v3999_v48  ;;  %v3932_v1 = vor.u32 %v4653_v58, %v3929_v59  ;;  %v4664_v48 = vld [vmem:[%s5288_s18 + $0xf4] sm:$0xf0]  ;;  %v4656_v22 = vld [vmem:[%s5288_s18 + $0xbc] sm:$0xf]  ;;  %v3881_v58 = vld [vmem:[%s5288_s18 + $0x70] sm:$0xf0] }
 0x68a   : > { %v3887_v59 = vld [vmem:[%s5288_s18 + $0x38] sm:$0xf] }
 0x68c   : > { %2059 = vmatpush.bf16.msrb.mxu1 %v3912_v62  ;;  %2098 = vmatpush.bf16.msra.mxu0 %v3924_v7  ;;  %v4654_v62 = vld [vmem:[%s5288_s18 + $0xac] sm:$0xf]  ;;  %v3865_v7 = vld [vmem:[%s5288_s18 + $0x60] sm:$0xf0] }
 0x68d   : > { %v3940_v5 = vor.u32 %v4654_v62, %v3937_v63  ;;  %v3868_v13 = vor.u32 %v4637_v6, %v3865_v7  ;;  %v3889_v62 = vld [vmem:[%s5288_s18 + $0x78] sm:$0xf0]  ;;  %v4703_v7 = vld [vmem:[%s5303_s28 + $0x30] sm:$0xff] }
 0x68e   : > { %v3892_v2 = vor.u32 %v4640_v61, %v3889_v62  ;;  %v4720_v6 = vld [vmem:[%s5303_s28 + $0xb8] sm:$0xff]  ;;  %v4739_v61 = vld [vmem:[%s5303_s28 + $0x150] sm:$0xff] }
 0x68f   : > { %v4747_v62 = vld [vmem:[%s5303_s28 + $0x190] sm:$0xff] }
 0x690   : > { %2060 = vmatpush.bf16.msrb.mxu1 %v3848_v14  ;;  %2099 = vmatpush.bf16.msra.mxu0 %v3860_v18  ;;  %v4071_v14 = vld [vmem:[%s5288_s18 + $0x1b0] sm:$0xf]  ;;  %v4687_v18 = vld [vmem:[%s5288_s18 + $0x1b4] sm:$0xf] }
 0x6f9   : > { %v1555_v37 = vpop.xlane.xlu2 %1554 }
 0x6fa   : > { %v1556_v44 = vmul.f32 %v1555_v37, %v5431_v40  ;;  %v4686_v37 = vld [vmem:[%s5288_s18 + $0x1ac] sm:$0xf] }
 0x6fb   : > { %v4068_v45 = vor.u32 %v4686_v37, %v4065_v38  ;;  %v4017_v37 = vld [vmem:[%s5288_s18 + $0x178] sm:$0xf0] }
 0x6fc   : > { %v1557_v53 = vadd.f32 1e-05, %v1556_v44  ;;  %v4064_v44 = vor.u32 %v4694_v36, %v4063_v34  ;;  %v4680_v34 = vld [vmem:[%s5288_s18 + $0x174] sm:$0xf0]  ;;  %v4672_v36 = vld [vmem:[%s5288_s18 + $0x13c] sm:$0xf] }
 0x6fd   : > { %v4016_v43 = vor.u32 %v4680_v34, %v4015_v33  ;;  %v4736_v33 = vld [vmem:[%s5303_s28 + $0x138] sm:$0xff] }
 0x6fe   : > { %4960 = vrsqrt.f32 %v1557_v53  ;;  %vm1564_vm3 = vweird.f32 %v1557_v53  ;;  %v4760_v34 = vld [vmem:[%s5303_s28 + $0x1f8] sm:$0xff] }
 0x704   : > { %v4961_v17 = vpop.eup %4960 }
 0x705   : > { %v1559_v19 = vmul.f32 %v4961_v17, %v1557_v53  ;;  %vm1565_vm2 = vweird.f32 %v4961_v17  ;;  %v3927_v53 = vld [vmem:[%s5288_s18 + $0xa0] sm:$0xf] }
 0x706   : > { %vm1566_vm4 = vmor %vm1564_vm3, %vm1565_vm2  ;;  %v3928_v0 = vor.u32 %v4661_v54, %v3927_v53  ;;  %v4647_v53 = vld [vmem:[%s5288_s18 + $0x6c] sm:$0xf0]  ;;  %v3952_v54 = vor.u32 %v4664_v48, %v3951_v47  ;;  %v4742_v47 = vld [vmem:[%s5303_s28 + $0x168] sm:$0xff] }
 0x707   : > { %v1560_v20 = vmul.f32 %v4961_v17, %v1559_v19  ;;  %v4073_v19 = vld [vmem:[%s5288_s18 + $0x1f0] sm:$0xf0]  ;;  %v4750_v48 = vld [vmem:[%s5303_s28 + $0x1a8] sm:$0xff] }
 0x709   : > { %v1561_v21 = vmul.f32 0.5, %v1560_v20  ;;  %v4079_v20 = vld [vmem:[%s5288_s18 + $0x1b8] sm:$0xf] }
 0x70b   : > { %v1562_v23 = vsub.f32 1.5, %v1561_v21  ;;  %v4696_v21 = vld [vmem:[%s5288_s18 + $0x1f4] sm:$0xf0] }
 0x70d   : > { %v1563_v24 = vmul.f32 %v4961_v17, %v1562_v23  ;;  %v4688_v23 = vld [vmem:[%s5288_s18 + $0x1bc] sm:$0xf] }
 0x70f   : > { %v1567_v26 = vsel %vm1566_vm4, %v4961_v17, %v1563_v24  ;;  %v3876_v17 = vor.u32 %v4638_v10, %v3873_v11  ;;  %v4081_v24 = vld [vmem:[%s5288_s18 + $0x1f8] sm:$0xf0]  ;;  %v4719_v10 = vld [vmem:[%s5303_s28 + $0xb0] sm:$0xff]  ;;  %v4702_v11 = vld [vmem:[%s5303_s28 + $0x28] sm:$0xff] }
 0x710   : > { %v1568_v28 = vmul.f32 %v1567_v26, %v5434_v42  ;;  %v4076_v26 = vor.u32 %v4687_v18, %v4073_v19  ;;  %v4084_v30 = vor.u32 %v4688_v23, %v4081_v24  ;;  %v4717_v18 = vld [vmem:[%s5303_s28 + $0xa0] sm:$0xff]  ;;  %v4700_v19 = vld [vmem:[%s5303_s28 + $0x18] sm:$0xff]  ;;  %v4699_v24 = vld [vmem:[%s5303_s28 + $0x10] sm:$0xff] }
 0x711   : > { %v4716_v23 = vld [vmem:[%s5303_s28 + $0x98] sm:$0xff] }
 0x712   : > { %v1572_v29 = vmul.f32 %v4920_v25, %v1568_v28  ;;  %v4072_v25 = vor.u32 %v4695_v15, %v4071_v14  ;;  %v4679_v28 = vld [vmem:[%s5288_s18 + $0x16c] sm:$0xf0]  ;;  %v4718_v14 = vld [vmem:[%s5303_s28 + $0xa8] sm:$0xff]  ;;  %v4701_v15 = vld [vmem:[%s5303_s28 + $0x20] sm:$0xff] }
 0x714   : > { %v5520_v35 = vadd.f32 %v4921_v27, %v1572_v29  ;;  %v4007_v27 = vld [vmem:[%s5288_s18 + $0x130] sm:$0xf]  ;;  %v4080_v29 = vor.u32 %v4696_v21, %v4079_v20  ;;  %v4724_v20 = vld [vmem:[%s5303_s28 + $0xd8] sm:$0xff] }
 0x715   : > { %v4008_v38 = vor.u32 %v4679_v28, %v4007_v27  ;;  %v4708_v21 = vld [vmem:[%s5303_s28 + $0x58] sm:$0xff]  ;;  %v4715_v27 = vld [vmem:[%s5303_s28 + $0x90] sm:$0xff]  ;;  %v4698_v28 = vld [vmem:[%s5303_s28 + $0x8] sm:$0xff] }
 0x716   : > { %v5527_v42 = vpack.c.bf16 %v5520_v35, %v5520_v35 }
 0x718   : > { %4085 = vmatmul.msk.bf16.vlgmr.msra.gmra.mxu1 %vm887_vm9, %v5527_v42  ;;  %4086 = vmatmul.msk.bf16.vlgmr.msra.gmra.mxu2 %vm887_vm9, %v5527_v42 }
 0x719   : > { %4087 = vmatmul.msk.bf16.vlgmr.msra.gmra.mxu3 %vm887_vm9, %v5527_v42  ;;  %4088 = vmatmul.msk.bf16.vlgmr.msrb.gmra.mxu0 %vm887_vm9, %v5527_v42 }
 0x71a   : > { %2109 = vmatpush.bf16.msra.mxu1 %v4056_v39  ;;  %2122 = vmatpush.bf16.msra.mxu2 %v4060_v57  ;;  %v4012_v39 = vor.u32 %v4671_v31, %v4009_v32  ;;  %v3943_v57 = vld [vmem:[%s5288_s18 + $0xb0] sm:$0xf]  ;;  %v4697_v31 = vld [vmem:[%s5303_s28] sm:$0xff] }
 0x71b   : > { %2135 = vmatpush.bf16.msra.mxu3 %v4064_v44  ;;  %2148 = vmatpush.bf16.msrb.mxu0 %v4068_v45  ;;  %v4020_v44 = vor.u32 %v4672_v36, %v4017_v37  ;;  %v4655_v45 = vld [vmem:[%s5288_s18 + $0xb4] sm:$0xf]  ;;  %v3944_v50 = vor.u32 %v4663_v41, %v3943_v57  ;;  %v4721_v32 = vld [vmem:[%s5303_s28 + $0xc0] sm:$0xff] }
 0x71c   : > { %v4705_v36 = vld [vmem:[%s5303_s28 + $0x40] sm:$0xff]  ;;  %v4735_v57 = vld [vmem:[%s5303_s28 + $0x130] sm:$0xff] }
 0x71d   : > { %v4713_v37 = vld [vmem:[%s5303_s28 + $0x80] sm:$0xff]  ;;  %v4759_v41 = vld [vmem:[%s5303_s28 + $0x1f0] sm:$0xff] }
 0x71e   : > { %2110 = vmatpush.bf16.msra.mxu1 %v3992_v51  ;;  %2123 = vmatpush.bf16.msra.mxu2 %v3996_v52  ;;  %v3948_v51 = vor.u32 %v4655_v45, %v3945_v46  ;;  %v3879_v52 = vld [vmem:[%s5288_s18 + $0x30] sm:$0xf]  ;;  %v4734_v45 = vld [vmem:[%s5303_s28 + $0x128] sm:$0xff] }
 0x71f   : > { %2136 = vmatpush.bf16.msra.mxu3 %v4000_v55  ;;  %2149 = vmatpush.bf16.msrb.mxu0 %v4004_v56  ;;  %v3956_v55 = vor.u32 %v4656_v22, %v3953_v49  ;;  %v4639_v56 = vld [vmem:[%s5288_s18 + $0x34] sm:$0xf]  ;;  %v3880_v63 = vor.u32 %v4647_v53, %v3879_v52  ;;  %v4758_v46 = vld [vmem:[%s5303_s28 + $0x1e8] sm:$0xff]  ;;  %v4733_v22 = vld [vmem:[%s5303_s28 + $0x120] sm:$0xff] }
 0x720   : > { %v4757_v49 = vld [vmem:[%s5303_s28 + $0x1e0] sm:$0xff]  ;;  %v4732_v52 = vld [vmem:[%s5303_s28 + $0x118] sm:$0xff] }
 0x721   : > { %v4756_v53 = vld [vmem:[%s5303_s28 + $0x1d8] sm:$0xff] }
 0x722   : > { %2111 = vmatpush.bf16.msra.mxu1 %v3928_v0  ;;  %2124 = vmatpush.bf16.msra.mxu2 %v3932_v1  ;;  %v3884_v0 = vor.u32 %v4639_v56, %v3881_v58  ;;  %v3888_v1 = vor.u32 %v4648_v60, %v3887_v59  ;;  %v4740_v56 = vld [vmem:[%s5303_s28 + $0x158] sm:$0xff]  ;;  %v4730_v59 = vld [vmem:[%s5303_s28 + $0x108] sm:$0xff] }
 0x723   : > { %2137 = vmatpush.bf16.msra.mxu3 %v3936_v4  ;;  %2150 = vmatpush.bf16.msrb.mxu0 %v3940_v5  ;;  %v4728_v4 = vld [vmem:[%s5303_s28 + $0xf8] sm:$0xff]  ;;  %v4754_v60 = vld [vmem:[%s5303_s28 + $0x1c8] sm:$0xff] }
 0x724   : > { %v4712_v5 = vld [vmem:[%s5303_s28 + $0x78] sm:$0xff] }
 0x725   : > { %v4748_v58 = vld [vmem:[%s5303_s28 + $0x198] sm:$0xff] }
 0x726   : > { %2112 = vmatpush.bf16.msra.mxu1 %v3864_v12  ;;  %2125 = vmatpush.bf16.msra.mxu2 %v3868_v13  ;;  %v4726_v12 = vld [vmem:[%s5303_s28 + $0xe8] sm:$0xff] }
 0x727   : > { %2138 = vmatpush.bf16.msra.mxu3 %v3872_v16  ;;  %2151 = vmatpush.bf16.msrb.mxu0 %v3876_v17  ;;  %v4710_v13 = vld [vmem:[%s5303_s28 + $0x68] sm:$0xff]  ;;  %v4725_v16 = vld [vmem:[%s5303_s28 + $0xe0] sm:$0xff] }
 0x728   : > { %4089 = vmatmul.msk.bf16.vlgmr.msrb.gmra.mxu1 %vm887_vm9, %v5527_v42  ;;  %4090 = vmatmul.msk.bf16.vlgmr.msrb.gmra.mxu2 %vm887_vm9, %v5527_v42  ;;  %v4709_v17 = vld [vmem:[%s5303_s28 + $0x60] sm:$0xff] }
 0x729   : > { %4091 = vmatmul.msk.bf16.vlgmr.msrb.gmra.mxu3 %vm887_vm9, %v5527_v42  ;;  %4092 = vmatmul.msk.bf16.vlgmr.msra.gmra.mxu0 %vm887_vm9, %v5527_v42 }
 0x72a   : > { %2161 = vmatpush.bf16.msrb.mxu1 %v4072_v25  ;;  %2174 = vmatpush.bf16.msrb.mxu2 %v4076_v26  ;;  %v4723_v25 = vld [vmem:[%s5303_s28 + $0xd0] sm:$0xff] }
 0x72b   : > { %2187 = vmatpush.bf16.msrb.mxu3 %v4080_v29  ;;  %2200 = vmatpush.bf16.msra.mxu0 %v4084_v30  ;;  %v4707_v26 = vld [vmem:[%s5303_s28 + $0x50] sm:$0xff]  ;;  %v4706_v29 = vld [vmem:[%s5303_s28 + $0x48] sm:$0xff] }
 0x72c   : > { %v4714_v30 = vld [vmem:[%s5303_s28 + $0x88] sm:$0xff] }
 0x72e   : > { %2162 = vmatpush.bf16.msrb.mxu1 %v4008_v38  ;;  %2175 = vmatpush.bf16.msrb.mxu2 %v4012_v39  ;;  %v4744_v38 = vld [vmem:[%s5303_s28 + $0x178] sm:$0xff] }
 0x72f   : > { %2188 = vmatpush.bf16.msrb.mxu3 %v4016_v43  ;;  %2201 = vmatpush.bf16.msra.mxu0 %v4020_v44  ;;  %v4752_v39 = vld [vmem:[%s5303_s28 + $0x1b8] sm:$0xff]  ;;  %v4743_v43 = vld [vmem:[%s5303_s28 + $0x170] sm:$0xff] }
 0x730   : > { %v4751_v44 = vld [vmem:[%s5303_s28 + $0x1b0] sm:$0xff] }
 0x732   : > { %2163 = vmatpush.bf16.msrb.mxu1 %v3944_v50  ;;  %2176 = vmatpush.bf16.msrb.mxu2 %v3948_v51  ;;  %v4741_v50 = vld [vmem:[%s5303_s28 + $0x160] sm:$0xff] }
 0x733   : > { %2189 = vmatpush.bf16.msrb.mxu3 %v3952_v54  ;;  %2202 = vmatpush.bf16.msra.mxu0 %v3956_v55  ;;  %v4749_v51 = vld [vmem:[%s5303_s28 + $0x1a0] sm:$0xff]  ;;  %v4731_v54 = vld [vmem:[%s5303_s28 + $0x110] sm:$0xff] }
 0x734   : > { %v4755_v55 = vld [vmem:[%s5303_s28 + $0x1d0] sm:$0xff] }
 0x736   : > { %2164 = vmatpush.bf16.msrb.mxu1 %v3880_v63  ;;  %2177 = vmatpush.bf16.msrb.mxu2 %v3884_v0  ;;  %v4729_v63 = vld [vmem:[%s5303_s28 + $0x100] sm:$0xff] }
 0x737   : > { %2190 = vmatpush.bf16.msrb.mxu3 %v3888_v1  ;;  %2203 = vmatpush.bf16.msra.mxu0 %v3892_v2  ;;  %v4753_v0 = vld [vmem:[%s5303_s28 + $0x1c0] sm:$0xff]  ;;  %v4738_v1 = vld [vmem:[%s5303_s28 + $0x148] sm:$0xff] }
 0x738   : > { %4093 = vmatmul.msk.bf16.vlgmr.msra.gmra.mxu1 %vm887_vm9, %v5527_v42  ;;  %4094 = vmatmul.msk.bf16.vlgmr.msra.gmra.mxu2 %vm887_vm9, %v5527_v42  ;;  %v4746_v2 = vld [vmem:[%s5303_s28 + $0x188] sm:$0xff] }
 0x739   : > { %4095 = vmatmul.msk.bf16.vlgmr.msra.gmra.mxu3 %vm887_vm9, %v5527_v42  ;;  %4096 = vmatmul.msk.bf16.vlgmr.msrb.gmra.mxu0 %vm887_vm9, %v5527_v42 }
 0x73a   : > { %3269 = vmatpush.bf16.msra.mxu1 %v4704_v3  ;;  %3282 = vmatpush.bf16.msra.mxu2 %v4712_v5  ;;  %v4737_v3 = vld [vmem:[%s5303_s28 + $0x140] sm:$0xff] }
 0x73b   : > { %3308 = vmatpush.bf16.msrb.mxu0 %v4728_v4  ;;  %3295 = vmatpush.bf16.msra.mxu3 %v4720_v6  ;;  %v4745_v4 = vld [vmem:[%s5303_s28 + $0x180] sm:$0xff] }
 0x73c   : > { %v5682_v5 = vld [vmem:[%s5293_s19] sm:$0xff] }
 0x73d   : > { %v1646_v6 = vperm.slane %v5682_v5, 0 }
 0x73e   : > { %3270 = vmatpush.bf16.msra.mxu1 %v4703_v7  ;;  %3283 = vmatpush.bf16.msra.mxu2 %v4711_v9  ;;  %v1649_v7 = vperm.slane %v5682_v5, 3 }
 0x73f   : > { %3309 = vmatpush.bf16.msrb.mxu0 %v4727_v8  ;;  %3296 = vmatpush.bf16.msra.mxu3 %v4719_v10 }
 0x742   : > { %3271 = vmatpush.bf16.msra.mxu1 %v4702_v11  ;;  %3284 = vmatpush.bf16.msra.mxu2 %v4710_v13  ;;  %v1647_v13 = vperm.slane %v5682_v5, 1 }
 0x743   : > { %3310 = vmatpush.bf16.msrb.mxu0 %v4726_v12  ;;  %3297 = vmatpush.bf16.msra.mxu3 %v4718_v14 }
 0x746   : > { %3272 = vmatpush.bf16.msra.mxu1 %v4701_v15  ;;  %3285 = vmatpush.bf16.msra.mxu2 %v4709_v17  ;;  %v1648_v15 = vperm.slane %v5682_v5, 2 }
 0x747   : > { %3311 = vmatpush.bf16.msrb.mxu0 %v4725_v16  ;;  %3298 = vmatpush.bf16.msra.mxu3 %v4717_v18  ;;  %v4768_v16 = vld [vmem:[%s5303_s28 + $0x238] sm:$0xff] }
 0x748   : > { %4097 = vmatmul.msk.bf16.vlgmr.msrb.gmra.mxu1 %vm887_vm9, %v5527_v42  ;;  %4098 = vmatmul.msk.bf16.vlgmr.msrb.gmra.mxu2 %vm887_vm9, %v5527_v42  ;;  %v4792_v18 = vld [vmem:[%s5303_s28 + $0x2f8] sm:$0xff] }
 0x749   : > { %4099 = vmatmul.msk.bf16.vlgmr.msrb.gmra.mxu3 %vm887_vm9, %v5527_v42  ;;  %4100 = vmatmul.msk.bf16.vlgmr.msra.gmra.mxu0 %vm887_vm9, %v5527_v42  ;;  %v4722_v42 = vld [vmem:[%s5303_s28 + $0xc8] sm:$0xff] }
 0x74a   : > { %3273 = vmatpush.bf16.msra.mxu1 %v4700_v19  ;;  %3286 = vmatpush.bf16.msra.mxu2 %v4708_v21 }
 0x74b   : > { %3312 = vmatpush.bf16.msrb.mxu0 %v4724_v20  ;;  %3299 = vmatpush.bf16.msra.mxu3 %v4716_v23 }
 0x74e   : > { %3274 = vmatpush.bf16.msra.mxu1 %v4699_v24  ;;  %3287 = vmatpush.bf16.msra.mxu2 %v4707_v26  ;;  %v4767_v26 = vld [vmem:[%s5303_s28 + $0x230] sm:$0xff] }
 0x74f   : > { %3313 = vmatpush.bf16.msrb.mxu0 %v4723_v25  ;;  %3300 = vmatpush.bf16.msra.mxu3 %v4715_v27 }
 0x752   : > { %3275 = vmatpush.bf16.msra.mxu1 %v4698_v28  ;;  %3288 = vmatpush.bf16.msra.mxu2 %v4706_v29 }
 0x753   : > { %3314 = vmatpush.bf16.msrb.mxu0 %v4722_v42  ;;  %3301 = vmatpush.bf16.msra.mxu3 %v4714_v30  ;;  %v4791_v42 = vld [vmem:[%s5303_s28 + $0x2f0] sm:$0xff]  ;;  %v4776_v30 = vld [vmem:[%s5303_s28 + $0x278] sm:$0xff] }
 0x756   : > { %3276 = vmatpush.bf16.msra.mxu1 %v4697_v31  ;;  %3289 = vmatpush.bf16.msra.mxu2 %v4705_v36  ;;  %v4790_v36 = vld [vmem:[%s5303_s28 + $0x2e8] sm:$0xff] }
 0x757   : > { %3315 = vmatpush.bf16.msrb.mxu0 %v4721_v32  ;;  %3302 = vmatpush.bf16.msra.mxu3 %v4713_v37  ;;  %v4784_v32 = vld [vmem:[%s5303_s28 + $0x2b8] sm:$0xff]  ;;  %v1650_v37 = vperm.slane %v5682_v5, 4 }
 0x75a   : > { %3321 = vmatpush.bf16.msrb.mxu1 %v4736_v33  ;;  %3334 = vmatpush.bf16.msrb.mxu2 %v4744_v38 }
 0x75b   : > { %3360 = vmatpush.bf16.msra.mxu0 %v4760_v34  ;;  %3347 = vmatpush.bf16.msrb.mxu3 %v4752_v39  ;;  %v4766_v34 = vld [vmem:[%s5303_s28 + $0x228] sm:$0xff]  ;;  %v1653_v39 = vperm.slane %v5682_v5, 7 }
 0x75e   : > { %3322 = vmatpush.bf16.msrb.mxu1 %v4735_v57  ;;  %3335 = vmatpush.bf16.msrb.mxu2 %v4743_v43  ;;  %v4775_v57 = vld [vmem:[%s5303_s28 + $0x270] sm:$0xff] }
 0x75f   : > { %3361 = vmatpush.bf16.msra.mxu0 %v4759_v41  ;;  %3348 = vmatpush.bf16.msrb.mxu3 %v4751_v44  ;;  %v4783_v43 = vld [vmem:[%s5303_s28 + $0x2b0] sm:$0xff] }
 0x762   : > { %3323 = vmatpush.bf16.msrb.mxu1 %v4734_v45  ;;  %3336 = vmatpush.bf16.msrb.mxu2 %v4742_v47  ;;  %v4765_v45 = vld [vmem:[%s5303_s28 + $0x220] sm:$0xff] }
 0x763   : > { %3362 = vmatpush.bf16.msra.mxu0 %v4758_v46  ;;  %3349 = vmatpush.bf16.msrb.mxu3 %v4750_v48  ;;  %v4789_v48 = vld [vmem:[%s5303_s28 + $0x2e0] sm:$0xff] }
 0x766   : > { %3324 = vmatpush.bf16.msrb.mxu1 %v4733_v22  ;;  %3337 = vmatpush.bf16.msrb.mxu2 %v4741_v50 }
 0x767   : > { %3363 = vmatpush.bf16.msra.mxu0 %v4757_v49  ;;  %3350 = vmatpush.bf16.msrb.mxu3 %v4749_v51  ;;  %v4774_v49 = vld [vmem:[%s5303_s28 + $0x268] sm:$0xff] }
 0x768   : > { %v4782_v51 = vld [vmem:[%s5303_s28 + $0x2a8] sm:$0xff] }
 0x76a   : > { %3325 = vmatpush.bf16.msrb.mxu1 %v4732_v52  ;;  %3338 = vmatpush.bf16.msrb.mxu2 %v4740_v56  ;;  %v1651_v52 = vperm.slane %v5682_v5, 5 }
 0x76b   : > { %3364 = vmatpush.bf16.msra.mxu0 %v4756_v53  ;;  %3351 = vmatpush.bf16.msrb.mxu3 %v4748_v58  ;;  %v4788_v58 = vld [vmem:[%s5303_s28 + $0x2d8] sm:$0xff] }
 0x76e   : > { %3326 = vmatpush.bf16.msrb.mxu1 %v4731_v54  ;;  %3339 = vmatpush.bf16.msrb.mxu2 %v4739_v61  ;;  %v1652_v54 = vperm.slane %v5682_v5, 6  ;;  %v4773_v61 = vld [vmem:[%s5303_s28 + $0x260] sm:$0xff] }
 0x76f   : > { %3365 = vmatpush.bf16.msra.mxu0 %v4755_v55  ;;  %3352 = vmatpush.bf16.msrb.mxu3 %v4747_v62  ;;  %v4764_v55 = vld [vmem:[%s5303_s28 + $0x218] sm:$0xff] }
 0x772   : > { %3327 = vmatpush.bf16.msrb.mxu1 %v4730_v59  ;;  %3340 = vmatpush.bf16.msrb.mxu2 %v4738_v1 }
 0x773   : > { %3366 = vmatpush.bf16.msra.mxu0 %v4754_v60  ;;  %3353 = vmatpush.bf16.msrb.mxu3 %v4746_v2 }
 0x776   : > { %3328 = vmatpush.bf16.msrb.mxu1 %v4729_v63  ;;  %3341 = vmatpush.bf16.msrb.mxu2 %v4737_v3  ;;  %v4763_v3 = vld [vmem:[%s5303_s28 + $0x210] sm:$0xff] }
 0x777   : > { %3367 = vmatpush.bf16.msra.mxu0 %v4753_v0  ;;  %3354 = vmatpush.bf16.msrb.mxu3 %v4745_v4  ;;  %v4781_v0 = vld [vmem:[%s5303_s28 + $0x2a0] sm:$0xff] }
 0x795   : > { %v2010_v8 = vpop.f32.mrf.mxu1 }
 0x796   : > { %v2011_v9 = vadd.f32 %v2010_v8, %v1646_v6  ;;  %v2049_v10 = vpop.f32.mrf.mxu0  ;;  %v4787_v6 = vld [vmem:[%s5303_s28 + $0x2d0] sm:$0xff]  ;;  %v4772_v8 = vld [vmem:[%s5303_s28 + $0x258] sm:$0xff] }
 0x797   : > { %v2050_v11 = vadd.f32 %v2049_v10, %v1649_v7 }
 0x798   : > { %v2209_v12 = vmax.f32 %v2011_v9, 0.0  ;;  %v5714_v9 = vld [vmem:[%s5293_s19 + $0x8] sm:$0xff]  ;;  %s4984_s19 = scalar_lea.hbm %s5910_s7, 16 }
 0x799   : > { %v2212_v14 = vmax.f32 %v2050_v11, 0.0  ;;  %v4780_v11 = vld [vmem:[%s5303_s28 + $0x298] sm:$0xff] }
 0x79a   : > { %v2225_v17 = vpack.c.bf16 %v2209_v12, %v2209_v12 }
 0x79b   : > { %v2228_v19 = vpack.c.bf16 %v2212_v14, %v2212_v14  ;;  %v2023_v20 = vpop.f32.mrf.mxu2  ;;  %v4786_v14 = vld [vmem:[%s5303_s28 + $0x2c8] sm:$0xff] }
 0x79c   : > { %v2024_v21 = vadd.f32 %v2023_v20, %v1647_v13  ;;  %v2036_v23 = vpop.f32.mrf.mxu3  ;;  %3277 = vmatmul.bf16.vlgmr.msra.gmra.mxu1 %v2225_v17  ;;  %v4762_v13 = vld [vmem:[%s5303_s28 + $0x208] sm:$0xff]  ;;  %v1657_v17 = vperm.slane %v5714_v9, 3  ;;  %v4779_v20 = vld [vmem:[%s5303_s28 + $0x290] sm:$0xff] }
 0x79d   : > { %v2037_v24 = vadd.f32 %v2036_v23, %v1648_v15  ;;  %3316 = vmatmul.bf16.vlgmr.msrb.gmra.mxu0 %v2228_v19  ;;  %3373 = vmatpush.bf16.msra.mxu1 %v4768_v16  ;;  %v2012_v25 = vpop.f32.mrf.mxu1  ;;  %v1654_v15 = vperm.slane %v5714_v9, 0  ;;  %v4761_v23 = vld [vmem:[%s5303_s28 + $0x200] sm:$0xff] }
 0x79e   : > { %v2210_v27 = vmax.f32 %v2024_v21, 0.0  ;;  %3412 = vmatpush.bf16.msrb.mxu0 %v4792_v18  ;;  %v2051_v28 = vpop.f32.mrf.mxu0  ;;  %v4771_v18 = vld [vmem:[%s5303_s28 + $0x250] sm:$0xff] }
 0x79f   : > { %v2211_v29 = vmax.f32 %v2037_v24, 0.0 }
 0x7a0   : > { %v2226_v31 = vpack.c.bf16 %v2210_v27, %v2210_v27  ;;  %v4800_v27 = vld [vmem:[%s5303_s28 + $0x338] sm:$0xff] }
 0x7a1   : > { %v2227_v33 = vpack.c.bf16 %v2211_v29, %v2211_v29  ;;  %3374 = vmatpush.bf16.msra.mxu1 %v4767_v26  ;;  %v4785_v26 = vld [vmem:[%s5303_s28 + $0x2c0] sm:$0xff]  ;;  %v4770_v29 = vld [vmem:[%s5303_s28 + $0x248] sm:$0xff] }
 0x7a2   : > { %3413 = vmatpush.bf16.msrb.mxu0 %v4791_v42  ;;  %3290 = vmatmul.bf16.vlgmr.msra.gmra.mxu2 %v2226_v31  ;;  %v4824_v42 = vld [vmem:[%s5303_s28 + $0x3f8] sm:$0xff]  ;;  %v4778_v31 = vld [vmem:[%s5303_s28 + $0x288] sm:$0xff] }
 0x7a3   : > { %3303 = vmatmul.bf16.vlgmr.msra.gmra.mxu3 %v2227_v33  ;;  %3386 = vmatpush.bf16.msra.mxu2 %v4776_v30  ;;  %v2025_v38 = vpop.f32.mrf.mxu2 }
 0x7a4   : > { %3399 = vmatpush.bf16.msra.mxu3 %v4784_v32  ;;  %v2038_v41 = vpop.f32.mrf.mxu3  ;;  %v1655_v32 = vperm.slane %v5714_v9, 1 }
 0x7a5   : > { %3375 = vmatpush.bf16.msra.mxu1 %v4766_v34  ;;  %v2062_v44 = vpop.f32.mrf.mxu1  ;;  %v1656_v34 = vperm.slane %v5714_v9, 2  ;;  %v4769_v41 = vld [vmem:[%s5303_s28 + $0x240] sm:$0xff] }
 0x7a6   : > { %3414 = vmatpush.bf16.msrb.mxu0 %v4790_v36  ;;  %v2063_v46 = vadd.f32 %v2062_v44, %v1650_v37  ;;  %v2101_v47 = vpop.f32.mrf.mxu0  ;;  %v4799_v37 = vld [vmem:[%s5303_s28 + $0x330] sm:$0xff] }
 0x7a7   : > { %v2102_v22 = vadd.f32 %v2101_v47, %v1653_v39  ;;  %3387 = vmatpush.bf16.msra.mxu2 %v4775_v57  ;;  %v4823_v57 = vld [vmem:[%s5303_s28 + $0x3f0] sm:$0xff] }
 0x7a8   : > { %v2213_v50 = vmax.f32 %v2063_v46, 0.0  ;;  %3400 = vmatpush.bf16.msra.mxu3 %v4783_v43  ;;  %v4808_v46 = vld [vmem:[%s5303_s28 + $0x378] sm:$0xff] }
 0x7a9   : > { %v2216_v53 = vmax.f32 %v2102_v22, 0.0  ;;  %3376 = vmatpush.bf16.msra.mxu1 %v4765_v45  ;;  %v4777_v45 = vld [vmem:[%s5303_s28 + $0x280] sm:$0xff]  ;;  %v4816_v22 = vld [vmem:[%s5303_s28 + $0x3b8] sm:$0xff] }
 0x7aa   : > { %v2229_v56 = vpack.c.bf16 %v2213_v50, %v2213_v50  ;;  %3415 = vmatpush.bf16.msrb.mxu0 %v4789_v48 }
 0x7ab   : > { %v2232_v59 = vpack.c.bf16 %v2216_v53, %v2216_v53  ;;  %3388 = vmatpush.bf16.msra.mxu2 %v4774_v49  ;;  %v2075_v60 = vpop.f32.mrf.mxu2  ;;  %v4822_v53 = vld [vmem:[%s5303_s28 + $0x3e8] sm:$0xff] }
 0x7ac   : > { %3401 = vmatpush.bf16.msra.mxu3 %v4782_v51  ;;  %v2076_v62 = vadd.f32 %v2075_v60, %v1651_v52  ;;  %v2088_v63 = vpop.f32.mrf.mxu3  ;;  %3329 = vmatmul.bf16.vlgmr.msrb.gmra.mxu1 %v2229_v56  ;;  %v4798_v51 = vld [vmem:[%s5303_s28 + $0x328] sm:$0xff] }
 0x7ad   : > { %v2089_v1 = vadd.f32 %v2088_v63, %v1652_v54  ;;  %3368 = vmatmul.bf16.vlgmr.msra.gmra.mxu0 %v2232_v59  ;;  %3377 = vmatpush.bf16.msra.mxu1 %v4764_v55  ;;  %v2064_v2 = vpop.f32.mrf.mxu1  ;;  %v4807_v55 = vld [vmem:[%s5303_s28 + $0x370] sm:$0xff]  ;;  %v4797_v59 = vld [vmem:[%s5303_s28 + $0x320] sm:$0xff]  ;;  %v4806_v63 = vld [vmem:[%s5303_s28 + $0x368] sm:$0xff] }
 0x7ae   : > { %v2214_v4 = vmax.f32 %v2076_v62, 0.0  ;;  %3416 = vmatpush.bf16.msrb.mxu0 %v4788_v58  ;;  %v2103_v5 = vpop.f32.mrf.mxu0  ;;  %v4815_v58 = vld [vmem:[%s5303_s28 + $0x3b0] sm:$0xff] }
 0x7af   : > { %v2215_v7 = vmax.f32 %v2089_v1, 0.0  ;;  %3389 = vmatpush.bf16.msra.mxu2 %v4773_v61  ;;  %v4821_v61 = vld [vmem:[%s5303_s28 + $0x3e0] sm:$0xff]  ;;  %v4814_v1 = vld [vmem:[%s5303_s28 + $0x3a8] sm:$0xff] }
 0x7b0   : > { %v2230_v10 = vpack.c.bf16 %v2214_v4, %v2214_v4  ;;  %3402 = vmatpush.bf16.msra.mxu3 %v4781_v0  ;;  %v4820_v4 = vld [vmem:[%s5303_s28 + $0x3d8] sm:$0xff]  ;;  %v4805_v5 = vld [vmem:[%s5303_s28 + $0x360] sm:$0xff] }
 0x7b1   : > { %v2231_v12 = vpack.c.bf16 %v2215_v7, %v2215_v7  ;;  %3378 = vmatpush.bf16.msra.mxu1 %v4763_v3  ;;  %v4796_v3 = vld [vmem:[%s5303_s28 + $0x318] sm:$0xff]  ;;  %v4795_v7 = vld [vmem:[%s5303_s28 + $0x310] sm:$0xff] }
 0x7b2   : > { %3417 = vmatpush.bf16.msrb.mxu0 %v4787_v6  ;;  %3342 = vmatmul.bf16.vlgmr.msrb.gmra.mxu2 %v2230_v10  ;;  %v4813_v6 = vld [vmem:[%s5303_s28 + $0x3a0] sm:$0xff] }
 0x7b3   : > { %3355 = vmatmul.bf16.vlgmr.msrb.gmra.mxu3 %v2231_v12  ;;  %3390 = vmatpush.bf16.msra.mxu2 %v4772_v8  ;;  %v2077_v16 = vpop.f32.mrf.mxu2  ;;  %v1658_v8 = vperm.slane %v5714_v9, 4  ;;  %v1661_v12 = vperm.slane %v5714_v9, 7 }
 0x7b4   : > { %3403 = vmatpush.bf16.msra.mxu3 %v4780_v11  ;;  %v2090_v19 = vpop.f32.mrf.mxu3  ;;  %v4819_v11 = vld [vmem:[%s5303_s28 + $0x3d0] sm:$0xff]  ;;  %v4812_v16 = vld [vmem:[%s5303_s28 + $0x398] sm:$0xff] }
 0x7b5   : > { %3379 = vmatpush.bf16.msra.mxu1 %v4762_v13  ;;  %v2114_v21 = vpop.f32.mrf.mxu1 }
 0x7b6   : > { %3418 = vmatpush.bf16.msrb.mxu0 %v4786_v14  ;;  %v2115_v24 = vadd.f32 %v2114_v21, %v1654_v15  ;;  %v2153_v25 = vpop.f32.mrf.mxu0  ;;  %v4804_v14 = vld [vmem:[%s5303_s28 + $0x358] sm:$0xff] }
 0x7b7   : > { %v2154_v28 = vadd.f32 %v2153_v25, %v1657_v17  ;;  %3391 = vmatpush.bf16.msra.mxu2 %v4771_v18  ;;  %v4794_v18 = vld [vmem:[%s5303_s28 + $0x308] sm:$0xff]  ;;  %v4811_v25 = vld [vmem:[%s5303_s28 + $0x390] sm:$0xff] }
 0x7b8   : > { %v2217_v30 = vmax.f32 %v2115_v24, 0.0  ;;  %3404 = vmatpush.bf16.msra.mxu3 %v4779_v20  ;;  %v4818_v20 = vld [vmem:[%s5303_s28 + $0x3c8] sm:$0xff]  ;;  %v1659_v24 = vperm.slane %v5714_v9, 5 }
 0x7b9   : > { %v2220_v33 = vmax.f32 %v2154_v28, 0.0  ;;  %3380 = vmatpush.bf16.msra.mxu1 %v4761_v23  ;;  %v4803_v23 = vld [vmem:[%s5303_s28 + $0x350] sm:$0xff] }
 0x7ba   : > { %v2233_v36 = vpack.c.bf16 %v2217_v30, %v2217_v30  ;;  %3419 = vmatpush.bf16.msrb.mxu0 %v4785_v26  ;;  %v1660_v26 = vperm.slane %v5714_v9, 6 }
 0x7bb   : > { %v2236_v38 = vpack.c.bf16 %v2220_v33, %v2220_v33  ;;  %3392 = vmatpush.bf16.msra.mxu2 %v4770_v29  ;;  %v2127_v39 = vpop.f32.mrf.mxu2  ;;  %v4817_v29 = vld [vmem:[%s5303_s28 + $0x3c0] sm:$0xff] }
 0x7bc   : > { %3405 = vmatpush.bf16.msra.mxu3 %v4778_v31  ;;  %v2128_v43 = vadd.f32 %v2127_v39, %v1655_v32  ;;  %v2140_v44 = vpop.f32.mrf.mxu3  ;;  %3381 = vmatmul.bf16.vlgmr.msra.gmra.mxu1 %v2233_v36  ;;  %v4802_v32 = vld [vmem:[%s5303_s28 + $0x348] sm:$0xff] }
 0x7bd   : > { %3425 = vmatpush.bf16.msrb.mxu1 %v4800_v27  ;;  %v2141_v47 = vadd.f32 %v2140_v44, %v1656_v34  ;;  %3420 = vmatmul.bf16.vlgmr.msrb.gmra.mxu0 %v2236_v38  ;;  %v2116_v48 = vpop.f32.mrf.mxu1  ;;  %v4793_v27 = vld [vmem:[%s5303_s28 + $0x300] sm:$0xff]  ;;  %v4810_v34 = vld [vmem:[%s5303_s28 + $0x388] sm:$0xff] }
 0x7be   : > { %3464 = vmatpush.bf16.msra.mxu0 %v4824_v42  ;;  %v2218_v49 = vmax.f32 %v2128_v43, 0.0  ;;  %v2155_v50 = vpop.f32.mrf.mxu0  ;;  %v4801_v38 = vld [vmem:[%s5303_s28 + $0x340] sm:$0xff] }
 0x7bf   : > { %v2219_v52 = vmax.f32 %v2141_v47, 0.0  ;;  %3393 = vmatpush.bf16.msra.mxu2 %v4769_v41 }
 0x7c0   : > { %v2234_v54 = vpack.c.bf16 %v2218_v49, %v2218_v49  ;;  %3406 = vmatpush.bf16.msra.mxu3 %v4777_v45 }
 0x7c1   : > { %3426 = vmatpush.bf16.msrb.mxu1 %v4799_v37  ;;  %v2235_v56 = vpack.c.bf16 %v2219_v52, %v2219_v52 }
 0x7c2   : > { %3465 = vmatpush.bf16.msra.mxu0 %v4823_v57  ;;  %3394 = vmatmul.bf16.vlgmr.msra.gmra.mxu2 %v2234_v54  ;;  %v4809_v57 = vld [vmem:[%s5303_s28 + $0x380] sm:$0xff] }
 0x7c3   : > { %3438 = vmatpush.bf16.msrb.mxu2 %v4808_v46  ;;  %3407 = vmatmul.bf16.vlgmr.msra.gmra.mxu3 %v2235_v56  ;;  %v2129_v60 = vpop.f32.mrf.mxu2  ;;  %v4922_v56 = vld [vmem:[%s761_s21] ss:$0 sm:$0xff]  ;;  %s5908_s21 = sld [smem:[#allocation10_spill]] }
 0x7c4   : > { %3451 = vmatpush.bf16.msrb.mxu3 %v4816_v22  ;;  %v2142_v62 = vpop.f32.mrf.mxu3 }
 0x7c5   : > { %3427 = vmatpush.bf16.msrb.mxu1 %v4798_v51  ;;  %v2166_v0 = vpop.f32.mrf.mxu1 }
 0x7c6   : > { %3466 = vmatpush.bf16.msra.mxu0 %v4822_v53  ;;  %v2205_v2 = vpop.f32.mrf.mxu0  ;;  %v2167_v19 = vadd.f32 %v2166_v0, %v1658_v8 }
 0x7c7   : > { %3439 = vmatpush.bf16.msrb.mxu2 %v4807_v55  ;;  %v2206_v21 = vadd.f32 %v2205_v2, %v1661_v12 }
 0x7c8   : > { %3452 = vmatpush.bf16.msrb.mxu3 %v4815_v58  ;;  %v2221_v28 = vmax.f32 %v2167_v19, 0.0 }
 0x7c9   : > { %3428 = vmatpush.bf16.msrb.mxu1 %v4797_v59  ;;  %v2224_v30 = vmax.f32 %v2206_v21, 0.0  ;;  %s4614_s28 = sshll.u32 %s5908_s21, 3 }
 0x7ca   : > { %3467 = vmatpush.bf16.msra.mxu0 %v4821_v61  ;;  %v2237_v37 = vpack.c.bf16 %v2221_v28, %v2221_v28  ;;  %s3526_s0 = scalar_lea.hbm %s5910_s7, %s4614_s28 }
 0x7cb   : > { %3440 = vmatpush.bf16.msrb.mxu2 %v4806_v63  ;;  %v2179_v10 = vpop.f32.mrf.mxu2  ;;  %v2240_v9 = vpack.c.bf16 %v2224_v30, %v2224_v30  ;;  %s3530_s17 = sshll.u32 %s3526_s0, 4  ;;  %s3531_s17 = int_to_ptr.hbm [resolvable:$true] %s3530_s17 }
 0x7cc   : > { %3453 = vmatpush.bf16.msrb.mxu3 %v4814_v1  ;;  %v2192_v13 = vpop.f32.mrf.mxu3  ;;  %v2180_v33 = vadd.f32 %v2179_v10, %v1659_v24  ;;  %s4978_s23 = sshra.s32 %s3531_s17, 4  ;;  %s4979_s23 = int_to_ptr.hbm [resolvable:$true] %s4978_s23 }
 0x7cd   : > { %3429 = vmatpush.bf16.msrb.mxu1 %v4796_v3  ;;  %v2168_v15 = vpop.f32.mrf.mxu1  ;;  %v2193_v36 = vadd.f32 %v2192_v13, %v1660_v26  ;;  %s4980_s22 = scalar_lea.hbm %s4979_s23, 8  ;;  %p4985_p5 = scmp.lt.s32.totalorder %s4979_s23, %s5910_s7 }
 0x7ce   : > { %3468 = vmatpush.bf16.msra.mxu0 %v4820_v4  ;;  %v2207_v17 = vpop.f32.mrf.mxu0  ;;  %v2222_v39 = vmax.f32 %v2180_v33, 0.0  ;;  %p4981_p1 = scmp.ne.s32.totalorder %s4979_s23, %s4980_s22  ;;  %p4986_p6 = scmp.lt.s32.totalorder %s4984_s19, %s4980_s22 }
 0x7cf   : > { %3441 = vmatpush.bf16.msrb.mxu2 %v4805_v5  ;;  %v2223_v41 = vmax.f32 %v2193_v36, 0.0 }
 0x7d0   : > { %3454 = vmatpush.bf16.msrb.mxu3 %v4813_v6  ;;  %v2238_v43 = vpack.c.bf16 %v2222_v39, %v2222_v39  ;;  %p4982_p2 = pnand %p4981_p1, %p5216_p3  ;;  %p4987_p7 = por %p4986_p6, %p4985_p5 }
 0x7d1   : > { %3430 = vmatpush.bf16.msrb.mxu1 %v4795_v7  ;;  %v2239_v44 = vpack.c.bf16 %v2223_v41, %v2223_v41 }
 0x7d2   : > { %3469 = vmatpush.bf16.msra.mxu0 %v4819_v11  ;;  %p4983_p4 = pneg %p4982_p2 }
 0x7d3   : > { %3442 = vmatpush.bf16.msrb.mxu2 %v4804_v14  ;;  %v2181_v42 = vpop.f32.mrf.mxu2 }
 0x7d4   : > { %3455 = vmatpush.bf16.msrb.mxu3 %v4812_v16  ;;  %v2194_v31 = vpop.f32.mrf.mxu3  ;;  %p4988_p8 = pnand %p4987_p7, %p4983_p4 }
 0x7d5   : > { %3431 = vmatpush.bf16.msrb.mxu1 %v4794_v18 }
 0x7d6   : > { %3470 = vmatpush.bf16.msra.mxu0 %v4818_v20 }
 0x7d7   : > { %3443 = vmatpush.bf16.msrb.mxu2 %v4803_v23 }
 0x7d8   : > { %3456 = vmatpush.bf16.msrb.mxu3 %v4811_v25 }
 0x7d9   : > { %3432 = vmatpush.bf16.msrb.mxu1 %v4793_v27 }
 0x7da   : > { %3471 = vmatpush.bf16.msra.mxu0 %v4817_v29 }
 0x7db   : > { %3444 = vmatpush.bf16.msrb.mxu2 %v4802_v32 }
 0x7dc   : > { %3457 = vmatpush.bf16.msrb.mxu3 %v4810_v34  ;;  %3433 = vmatmul.bf16.vlgmr.msrb.gmra.mxu1 %v2237_v37 }
 0x7dd   : > { %3472 = vmatmul.bf16.vlgmr.msra.gmra.mxu0 %v2240_v9 }
 0x7df   : > { %3445 = vmatpush.bf16.msrb.mxu2 %v4801_v38 }
 0x7e0   : > { %3458 = vmatpush.bf16.msrb.mxu3 %v4809_v57 }
 0x7e2   : > { %3446 = vmatmul.bf16.vlgmr.msrb.gmra.mxu2 %v2238_v43 }
 0x7e3   : > { %3459 = vmatmul.bf16.vlgmr.msrb.gmra.mxu3 %v2239_v44 }
 0x819   : > { %v3278_v45 = vpop.f32.mrf.mxu1 }
 0x81a   : > { %v3317_v46 = vpop.f32.mrf.mxu0  ;;  %v3279_v60 = vadd.f32 %v4922_v56, %v3278_v45 }
 0x821   : > { %v3280_v47 = vpop.f32.mrf.mxu1 }
 0x822   : > { %v3319_v48 = vpop.f32.mrf.mxu0 }
 0x825   : > { %v3291_v22 = vpop.f32.mrf.mxu2 }
 0x826   : > { %v3304_v49 = vpop.f32.mrf.mxu3  ;;  %v3292_v63 = vadd.f32 %v3291_v22, %v3279_v60  ;;  %v4924_v22 = vld [vmem:[%s767_s24] ss:$0 sm:$0xff] }
 0x828   : > { %v3305_v2 = vadd.f32 %v3304_v49, %v3292_v63 }
 0x829   : > { %v3330_v50 = vpop.f32.mrf.mxu1 }
 0x82a   : > { %v3369_v51 = vpop.f32.mrf.mxu0  ;;  %v3318_v5 = vadd.f32 %v3317_v46, %v3305_v2 }
 0x82c   : > { %v3331_v8 = vadd.f32 %v3330_v50, %v3318_v5  ;;  %v4925_v50 = vld [vmem:[#allocation2] ss:$0 sm:$0xff] }
 0x82d   : > { %v3293_v52 = vpop.f32.mrf.mxu2 }
 0x82e   : > { %v3306_v53 = vpop.f32.mrf.mxu3 }
 0x831   : > { %v3332_v54 = vpop.f32.mrf.mxu1 }
 0x832   : > { %v3371_v55 = vpop.f32.mrf.mxu0 }
 0x835   : > { %v3343_v58 = vpop.f32.mrf.mxu2 }
 0x836   : > { %v3356_v59 = vpop.f32.mrf.mxu3  ;;  %v3344_v10 = vadd.f32 %v3343_v58, %v3331_v8 }
 0x838   : > { %v3357_v11 = vadd.f32 %v3356_v59, %v3344_v10 }
 0x839   : > { %v3382_v61 = vpop.f32.mrf.mxu1 }
 0x83a   : > { %v3421_v62 = vpop.f32.mrf.mxu0  ;;  %v3370_v14 = vadd.f32 %v3369_v51, %v3357_v11 }
 0x83c   : > { %v3383_v15 = vadd.f32 %v3382_v61, %v3370_v14 }
 0x83d   : > { %v3345_v0 = vpop.f32.mrf.mxu2 }
 0x83e   : > { %v3358_v1 = vpop.f32.mrf.mxu3 }
 0x841   : > { %v3384_v3 = vpop.f32.mrf.mxu1 }
 0x842   : > { %v3423_v4 = vpop.f32.mrf.mxu0 }
 0x845   : > { %v3395_v6 = vpop.f32.mrf.mxu2 }
 0x846   : > { %v3408_v7 = vpop.f32.mrf.mxu3  ;;  %v3396_v17 = vadd.f32 %v3395_v6, %v3383_v15 }
 0x848   : > { %v3409_v19 = vadd.f32 %v3408_v7, %v3396_v17 }
 0x84a   : > { %v3422_v21 = vadd.f32 %v3421_v62, %v3409_v19 }
 0x84d   : > { %v3397_v12 = vpop.f32.mrf.mxu2 }
 0x84e   : > { %v3410_v13 = vpop.f32.mrf.mxu3 }
 0x859   : > { %v3434_v16 = vpop.f32.mrf.mxu1 }
 0x85a   : > { %v3473_v18 = vpop.f32.mrf.mxu0  ;;  %v3435_v24 = vadd.f32 %v3434_v16, %v3422_v21 }
 0x861   : > { %v3436_v20 = vpop.f32.mrf.mxu1 }
 0x862   : > { %v3475_v23 = vpop.f32.mrf.mxu0 }
 0x865   : > { %v3447_v25 = vpop.f32.mrf.mxu2 }
 0x866   : > { %v3448_v26 = vadd.f32 %v3447_v25, %v3435_v24  ;;  %v3460_v27 = vpop.f32.mrf.mxu3 }
 0x868   : > { %v3461_v28 = vadd.f32 %v3460_v27, %v3448_v26 }
 0x86a   : > { %v3474_v42 = vadd.f32 %v3473_v18, %v3461_v28 }
 0x86c   : > { %v3477_v29 = vadd.f32 %v3474_v42, %v5520_v35 }
 0x86d   : > { %v3449_v30 = vpop.f32.mrf.mxu2 }
 0x86e   : > { %v3462_v31 = vpop.f32.mrf.mxu3  ;;  %v3480_v32 = vsel %vm887_vm9, %v3477_v29, 0.0 }
 0x86f   : > { %3481 = vadd.xlane.f32.xlu1 %v3480_v32 }
 0x8e2   : > { %v3482_v33 = vpop.xlane.xlu1 %3481 }
 0x8e3   : > { %v3483_v34 = vmul.f32 %v3482_v33, %v5431_v40 }
 0x8e5   : > { %v3484_v36 = vsub.f32 %v3477_v29, %v3483_v34 }
 0x8e7   : > { %v3485_v37 = vmul.f32 %v3484_v36, %v3484_v36 }
 0x8e9   : > { %v3486_v9 = vsel %vm887_vm9, %v3485_v37, 0.0 }
 0x8ea   : > { %3487 = vadd.xlane.f32.xlu0 %v3486_v9 }
 0x95d   : > { %v3488_v38 = vpop.xlane.xlu0 %3487 }
 0x95e   : > { %v3489_v39 = vmul.f32 %v3488_v38, %v5431_v40  ;;  %v4923_v40 = vld [vmem:[%s764_s6] ss:$0 sm:$0xff]  ;;  %s5912_s6 = sand.u32 1, %s5909_s20  }
 0x95f   : > { %s3516_s4 = scalar_lea.sflag [#allocation4], %s5912_s6 }
 0x960   : > { %v3490_v35 = vadd.f32 1e-05, %v3489_v39 }
 0x962   : > { %4962 = vrsqrt.f32 %v3490_v35  ;;  %vm3497_vm6 = vweird.f32 %v3490_v35 }
 0x968   : > { %v4963_v57 = vpop.eup %4962 }
 0x969   : > { %v3492_v41 = vmul.f32 %v4963_v57, %v3490_v35  ;;  %vm3498_vm5 = vweird.f32 %v4963_v57 }
 0x96a   : > { %vm3499_vm7 = vmor %vm3497_vm6, %vm3498_vm5 }
 0x96b   : > { %v3493_v43 = vmul.f32 %v4963_v57, %v3492_v41 }
 0x96d   : > { %v3494_v44 = vmul.f32 0.5, %v3493_v43 }
 0x96f   : > { %v3495_v45 = vsub.f32 1.5, %v3494_v44 }
 0x971   : > { %v3496_v46 = vmul.f32 %v4963_v57, %v3495_v45 }
 0x973   : > { %v3500_v47 = vsel %vm3499_vm7, %v4963_v57, %v3496_v46 }
 0x974   : > { %v3501_v48 = vmul.f32 %v3500_v47, %v3484_v36 }
 0x976   : > { %v3505_v49 = vmul.f32 %v4923_v40, %v3501_v48 }
 0x978   : > { %v3509_v51 = vadd.f32 %v4924_v22, %v3505_v49 }
 0x97a   : > { %v3513_v52 = vadd.f32 %v4925_v50, %v3509_v51 }
 0x97c   : > { %3514 = vst.msk [vmem:[%s5313_s27] sm:$0xff] %vm887_vm9, %v3513_v52 }
 0x97d   : > { %4991 = shalt.err (!%p4988_p8)
}
 0x97e   : > { %4825 = dma.vmem_to_hbm [thread:$0]  (%p5216_p3), %s3529_s30, 128, %s3531_s17, %s3516_s4  }
 0x97f PF: > { %s5913_s27 = sld [smem:[#allocation13_spill]] }
 0x980   : > { %s5914_s25 = sld [smem:[#allocation6_spill]] }
 0x985   : > { %p4831_p10 = scmp.ge.s32.totalorder %s5913_s27, 2 }
 0x986   : > { %s3542_s20 = sand.u32 1, %s5914_s25  }
 0x987   : > { %p4828_p11 = pnand %p4831_p10, %p5226_p9  ;;  %s3543_s3 = scalar_lea.sflag [#allocation4], %s3542_s20 }
 0x989   : > { %p4829_p12 = pneg %p4828_p11 }
 0x98b   : > { %5025 = dma.done.wait (%p4829_p12), %s3543_s3, 128  }
 0x98c   : > { %5027 = vsyncadd (%p4829_p12), %s3543_s3, 4294967168  ;;  %s30_s30 = sadd.s32 1, %s5913_s27   ;;  %s5916_s24 = sld [smem:[#allocation7_spill]] }
 0x98d   : > { %p27_p13 = scmp.ge.s32.totalorder %s30_s30, 6   ;;  %s5917_s25 = sld [smem:[#allocation8_spill]] }
 0x98e   : > { %s5918_s26 = sld [smem:[#allocation18_spill]] }
 0x98f   : > { %s5919_s27 = sld [smem:[#allocation11_spill]]  ;;  %29 = sbr.rel (!%p27_p13) target bundleno = 15 (0xf), region = 166 }
 0x990   : > { %s5920_s28 = sld [smem:[#allocation12_spill]] }
 0x991   : > { %s5921_s29 = sld [smem:[#allocation14_spill]] }
 0x992   : > { %s5922_s0 = sld [smem:[#allocation16_spill]] }
 0x994   :  { %3549 = vsyncpa [#allocation4], 1 }
 0x995   :  { %3551 = vsyncpa [#allocation4 + $0x1], 1 }

</bundles_post_ra>
